<compile_context>
chip_gen: v7x
topology: tpu7x:2x2x1
jax: 0.10.0
libtpu: 0.0.40
codegen_flags: <defaults>
</compile_context>

<pallas_src>
import math

import jax
import jax.numpy as jnp
from jax.experimental import pallas as pl

# ----------------------------- config ---------------------------------------
IMAGE_SIZE = 16
PATCH_SIZE = 4
NUM_CLASSES = 10
DIM = 32
DEPTH = 2
HEADS = 4
MLP_DIM = 64
CHANNELS = 3
BATCH = 2

NUM_PATCHES = (IMAGE_SIZE // PATCH_SIZE) ** 2      # 16
PATCH_DIM = CHANNELS * PATCH_SIZE ** 2             # 48
SEQ = NUM_PATCHES + 1                              # 17 tokens (attention "batch" axis)
SEQ_PAD = ((SEQ + 7) // 8) * 8                     # 24 (8-aligned row blocks)
ROWS = BATCH * SEQ_PAD                             # 48 slab rows
HEAD_DIM = DIM // HEADS                            # 8
LN_EPS = 1e-5
SCALE = 1.0 / math.sqrt(HEAD_DIM)

LANES = 2 * DIM                                    # 64 = packed lane width

# --- row offsets inside the packed matrix slab `wmat` (all multiples of 8) ---
OFF_EMB = 0                           # (PATCH_DIM, DIM)   patch_to_embedding.weight^T
OFF_ADD = OFF_EMB + PATCH_DIM         # (ROWS, DIM)        cls/pos/bias additive slab
OFF_PERM = OFF_ADD + ROWS             # (ROWS, ROWS)       cross-image row permutation
OFF_DMASK = OFF_PERM + ROWS           # (2*DIM, 2*DIM)     signed head-score mask
OFF_SEL = OFF_DMASK + 2 * DIM         # (8, ROWS)          cls-row selector (rows>=BATCH zero)
OFF_HEADW = OFF_SEL + 8               # (DIM, NUM_CLASSES) mlp_head Linear.weight^T
OFF_LAYERS = OFF_HEADW + DIM          # per-layer weight blocks start here

LQ = 0                                # (DIM,  2*DIM)  [Wq | Wq] * scale
LK = LQ + DIM                         # (2*DIM,2*DIM)  blockdiag(Wk, Wk)
LV = LK + 2 * DIM                     # (2*DIM,2*DIM)  blockdiag(Wv, Wv)
LO = LV + 2 * DIM                     # (2*DIM, DIM)   [Wo ; Wo]
L1 = LO + 2 * DIM                     # (DIM, MLP_DIM) linear1.weight^T
L2 = L1 + DIM                         # (MLP_DIM, DIM) linear2.weight^T
LAYER_ROWS = L2 + MLP_DIM             # 320
WMAT_ROWS = OFF_LAYERS + DEPTH * LAYER_ROWS        # 888

# --- row offsets inside the packed vector slab `vecs` ------------------------
V_PER_LAYER = 16
V_BQ, V_BK, V_BV, V_BO, V_C1, V_C2, V_G1, V_BE1, V_G2, V_BE2 = range(10)
V_HEAD = DEPTH * V_PER_LAYER          # 32
V_HG, V_HB, V_HC = 0, 1, 2
VECS_ROWS = V_HEAD + 8                # 40


# ----------------------------- in-kernel helpers ----------------------------
def _mm(a, b):
    return jnp.dot(a, b, preferred_element_type=jnp.float32)


def _layernorm(x, g, b):
    mu = jnp.mean(x, axis=-1, keepdims=True)
    xc = x - mu
    var = jnp.mean(xc * xc, axis=-1, keepdims=True)
    return xc * jax.lax.rsqrt(var + LN_EPS) * g + b


# ----------------------------- the fused kernel -----------------------------
def vit_kernel(pp_ref, wmat_ref, vecs_ref, o_ref):
    # ---- constants shared across layers (static, 8-aligned ref slices) ----
    wemb = wmat_ref[OFF_EMB:OFF_EMB + PATCH_DIM, :DIM]
    add = wmat_ref[OFF_ADD:OFF_ADD + ROWS, :DIM]
    perm = wmat_ref[OFF_PERM:OFF_PERM + ROWS, :ROWS]
    dmask = wmat_ref[OFF_DMASK:OFF_DMASK + LANES, :]

    # ---- patch embedding (cls/pos/bias terms precomputed into `add`) ----
    x = _mm(pp_ref[...], wemb) + add                       # (ROWS, DIM)

    # ---- encoder layers, statically unrolled over depth ----
    for d in range(DEPTH):
        mb = OFF_LAYERS + d * LAYER_ROWS
        vb = d * V_PER_LAYER
        wq2 = wmat_ref[mb + LQ:mb + LQ + DIM, :]           # (32, 64)
        wk2 = wmat_ref[mb + LK:mb + LK + LANES, :]         # (64, 64)
        wv2 = wmat_ref[mb + LV:mb + LV + LANES, :]         # (64, 64)
        wo2 = wmat_ref[mb + LO:mb + LO + LANES, :DIM]      # (64, 32)
        w1 = wmat_ref[mb + L1:mb + L1 + DIM, :]            # (32, 64)
        w2 = wmat_ref[mb + L2:mb + L2 + MLP_DIM, :DIM]     # (64, 32)

        bq2 = vecs_ref[vb + V_BQ:vb + V_BQ + 1, :]
        bk2 = vecs_ref[vb + V_BK:vb + V_BK + 1, :]
        bv2 = vecs_ref[vb + V_BV:vb + V_BV + 1, :]
        bo = vecs_ref[vb + V_BO:vb + V_BO + 1, :DIM]
        c1 = vecs_ref[vb + V_C1:vb + V_C1 + 1, :]
        c2 = vecs_ref[vb + V_C2:vb + V_C2 + 1, :DIM]
        g1 = vecs_ref[vb + V_G1:vb + V_G1 + 1, :DIM]
        be1 = vecs_ref[vb + V_BE1:vb + V_BE1 + 1, :DIM]
        g2 = vecs_ref[vb + V_G2:vb + V_G2 + 1, :DIM]
        be2 = vecs_ref[vb + V_BE2:vb + V_BE2 + 1, :DIM]

        # Cross-image swap (batch_first=False: attention runs over the 2-image
        # sequence for every token) routed through the idle MXU.
        xs = _mm(perm, x)                                  # rows of the other image
        xp = jnp.concatenate([x, xs], axis=1)              # (ROWS, 64)

        # q/k/v directly in packed 64-lane layout: [self-half | other-half].
        qp = _mm(x, wq2) + bq2                             # [q | q], already scaled
        kp = _mm(xp, wk2) + bk2                            # [k_self | k_other]
        vp = _mm(xp, wv2) + bv2                            # [v_self | v_other]

        # Signed per-head reduction: diff = s_other - s_self in half 0 and the
        # negation in half 1, replicated over each head's 8 lanes.  The 2-way
        # softmax then collapses to a sigmoid: no cross-half max/sum/fold, no
        # lane-unaligned slices.  (Pad rows 17..23 per image carry bias-only
        # content and stay finite; they are never read back.)
        diff = _mm(qp * kp, dmask)                         # (ROWS, 64)
        p = pl.reciprocal(1.0 + jnp.exp(diff), approx=False)

        # Branch folding + out-projection fused into one matmul ([Wo ; Wo]),
        # then residual + post-norm, ReLU FFN + residual + post-norm.
        y = x + _mm(p * vp, wo2) + bo
        y = _layernorm(y, g1, be1)
        hdn = jnp.maximum(_mm(y, w1) + c1, 0.0)
        y = y + _mm(hdn, w2) + c2
        x = _layernorm(y, g2, be2)

    # ---- cls-token extraction (one-hot selector rows) + mlp head ----
    sel = wmat_ref[OFF_SEL:OFF_SEL + 8, :ROWS]             # rows >= BATCH are zero
    hw = wmat_ref[OFF_HEADW:OFF_HEADW + DIM, :NUM_CLASSES]
    hg = vecs_ref[V_HEAD + V_HG:V_HEAD + V_HG + 1, :DIM]
    hb = vecs_ref[V_HEAD + V_HB:V_HEAD + V_HB + 1, :DIM]
    hc = vecs_ref[V_HEAD + V_HC:V_HEAD + V_HC + 1, :NUM_CLASSES]

    xc = _mm(sel, x)                                       # (8, DIM)
    xn = _layernorm(xc, hg, hb)
    logits = _mm(xn, hw) + hc                              # (8, NUM_CLASSES)
    o_ref[...] = logits[:BATCH, :].astype(o_ref.dtype)


# ----------------------------- wrapper ---------------------------------------
def vit_forward(img, wmat, vecs):
    b, c, h, w = img.shape
    p = PATCH_SIZE
    hp, wp = h // p, w // p

    # Faithful to: img.unfold(2,p,p).unfold(3,p,p).reshape(B, -1, p*p*3)
    x6 = img.reshape(b, c, hp, p, wp, p).transpose(0, 1, 2, 4, 3, 5)
    patches = x6.reshape(b, hp * wp, p * p * c)            # (B, 16, 48)

    # Slab per image: row 0 = cls (zeros; its embedding comes from the packed
    # additive), rows 1..16 = patches, rows 17..23 = padding.  Single pad op.
    pp = jnp.pad(patches, ((0, 0), (1, SEQ_PAD - SEQ), (0, 0)))
    pp = pp.reshape(b * SEQ_PAD, PATCH_DIM)

    return pl.pallas_call(
        vit_kernel,
        out_shape=jax.ShapeDtypeStruct((b, NUM_CLASSES), jnp.float32),
    )(pp, wmat, vecs)


# ----------------------------- deterministic params -------------------------
def init_raw_params(key):
    counter = [0]

    def nrm(shape, scale=0.1):
        counter[0] += 1
        k = jax.random.fold_in(key, counter[0])
        return scale * jax.random.normal(k, shape, dtype=jnp.float32)

    layers = []
    for _ in range(DEPTH):
        layers.append({
            "wq": nrm((DIM, DIM)), "bq": nrm((DIM,)),
            "wk": nrm((DIM, DIM)), "bk": nrm((DIM,)),
            "wv": nrm((DIM, DIM)), "bv": nrm((DIM,)),
            "wo": nrm((DIM, DIM)), "bo": nrm((DIM,)),
            "g1": 1.0 + nrm((DIM,), 0.02), "be1": nrm((DIM,), 0.02),
            "w1": nrm((DIM, MLP_DIM)), "c1": nrm((MLP_DIM,)),
            "w2": nrm((MLP_DIM, DIM)), "c2": nrm((DIM,)),
            "g2": 1.0 + nrm((DIM,), 0.02), "be2": nrm((DIM,), 0.02),
        })
    return {
        "pos_embedding": nrm((SEQ, DIM)),
        "cls_token": nrm((DIM,)),
        "w_embed": nrm((PATCH_DIM, DIM)),          # (in, out) = weight^T
        "b_embed": nrm((DIM,)),
        "head_g": 1.0 + nrm((DIM,), 0.02),
        "head_b": nrm((DIM,), 0.02),
        "head_w": nrm((DIM, NUM_CLASSES)),
        "head_c": nrm((NUM_CLASSES,)),
        "layers": layers,
    }


def pack_params(raw):
    """Pack all parameters + derived constants into two VMEM-friendly slabs."""
    f32 = jnp.float32

    def pad_cols(a):
        a = jnp.asarray(a, f32)
        return jnp.pad(a, ((0, 0), (0, LANES - a.shape[1])))

    # Additive slab: row 0 = cls + pos[0]; rows 1..16 = pos[t] + b_embed.
    blk = jnp.zeros((SEQ_PAD, DIM), f32)
    blk = blk.at[0].set(raw["cls_token"] + raw["pos_embedding"][0])
    blk = blk.at[1:SEQ].set(raw["pos_embedding"][1:] + raw["b_embed"])
    additive = jnp.tile(blk, (BATCH, 1))

    # Cross-image permutation: row r picks row (r + SEQ_PAD) % ROWS.
    perm = jax.nn.one_hot((jnp.arange(ROWS) + SEQ_PAD) % ROWS, ROWS, dtype=f32)

    # Signed head mask: column j sums +/- over the 8 lanes of j's head so that
    # (q*k_packed) @ dmask = [s_other - s_self | s_self - s_other].
    head_id = jnp.arange(DIM) // HEAD_DIM
    same = (head_id[:, None] == head_id[None, :]).astype(f32)
    dmask = jnp.block([[-same, same], [same, -same]])

    # cls-row selector (8 rows for clean sublane shape; rows >= BATCH zero).
    sel = jnp.zeros((8, ROWS), f32)
    sel = sel.at[jnp.arange(BATCH), jnp.arange(BATCH) * SEQ_PAD].set(1.0)

    blocks = [
        pad_cols(raw["w_embed"]),      # OFF_EMB
        pad_cols(additive),            # OFF_ADD
        pad_cols(perm),                # OFF_PERM
        pad_cols(dmask),               # OFF_DMASK
        pad_cols(sel),                 # OFF_SEL
        pad_cols(raw["head_w"]),       # OFF_HEADW
    ]
    z = jnp.zeros((DIM, DIM), f32)
    for L in raw["layers"]:
        wq2 = jnp.concatenate([L["wq"], L["wq"]], axis=1) * SCALE
        wk2 = jnp.block([[L["wk"], z], [z, L["wk"]]])
        wv2 = jnp.block([[L["wv"], z], [z, L["wv"]]])
        wo2 = jnp.concatenate([L["wo"], L["wo"]], axis=0)
        blocks += [pad_cols(wq2), pad_cols(wk2), pad_cols(wv2),
                   pad_cols(wo2), pad_cols(L["w1"]), pad_cols(L["w2"])]
    wmat = jnp.concatenate(blocks, axis=0)
    assert wmat.shape == (WMAT_ROWS, LANES)

    def vrow(a):
        a = jnp.asarray(a, f32).reshape(1, -1)
        return jnp.pad(a, ((0, 0), (0, LANES - a.shape[1])))

    vrows = []
    for L in raw["layers"]:
        vrows += [
            vrow(jnp.concatenate([L["bq"], L["bq"]]) * SCALE),
            vrow(jnp.concatenate([L["bk"], L["bk"]])),
            vrow(jnp.concatenate([L["bv"], L["bv"]])),
            vrow(L["bo"]), vrow(L["c1"]), vrow(L["c2"]),
            vrow(L["g1"]), vrow(L["be1"]), vrow(L["g2"]), vrow(L["be2"]),
            jnp.zeros((V_PER_LAYER - 10, LANES), f32),
        ]
    vrows += [vrow(raw["head_g"]), vrow(raw["head_b"]), vrow(raw["head_c"]),
              jnp.zeros((VECS_ROWS - V_HEAD - 3, LANES), f32)]
    vecs = jnp.concatenate(vrows, axis=0)
    assert vecs.shape == (VECS_ROWS, LANES)
    return wmat, vecs


# ----------------------------- plain-JAX reference --------------------------
def _layernorm_ref(x, g, b):
    mu = jnp.mean(x, axis=-1, keepdims=True)
    var = jnp.mean((x - mu) ** 2, axis=-1, keepdims=True)
    return (x - mu) * jax.lax.rsqrt(var + LN_EPS) * g + b


def vit_reference(img, raw):
    """Eval-mode forward with the exact PyTorch semantics (for validation)."""
    b = img.shape[0]
    hp = wp = IMAGE_SIZE // PATCH_SIZE
    x6 = img.reshape(b, CHANNELS, hp, PATCH_SIZE, wp, PATCH_SIZE)
    patches = x6.transpose(0, 1, 2, 4, 3, 5).reshape(b, NUM_PATCHES, PATCH_DIM)
    x = patches @ raw["w_embed"] + raw["b_embed"]
    cls = jnp.broadcast_to(raw["cls_token"], (b, 1, DIM))
    x = jnp.concatenate([cls, x], axis=1) + raw["pos_embedding"][None]

    for L in raw["layers"]:
        q = (x @ L["wq"] + L["bq"]) * SCALE
        k = x @ L["wk"] + L["bk"]
        v = x @ L["wv"] + L["bv"]
        qh = q.reshape(b, SEQ, HEADS, HEAD_DIM)
        kh = k.reshape(b, SEQ, HEADS, HEAD_DIM)
        vh = v.reshape(b, SEQ, HEADS, HEAD_DIM)
        # batch_first=False: attention runs over the image-batch axis (len 2).
        s = jnp.einsum("inhd,jnhd->nhij", qh, kh)
        a = jax.nn.softmax(s, axis=-1)
        o = jnp.einsum("nhij,jnhd->inhd", a, vh).reshape(b, SEQ, DIM)
        x = _layernorm_ref(x + o @ L["wo"] + L["bo"], L["g1"], L["be1"])
        hdn = jnp.maximum(x @ L["w1"] + L["c1"], 0.0)
        x = _layernorm_ref(x + hdn @ L["w2"] + L["c2"], L["g2"], L["be2"])

    xn = _layernorm_ref(x[:, 0], raw["head_g"], raw["head_b"])
    return xn @ raw["head_w"] + raw["head_c"]


if __name__ == "__main__":
    root = jax.random.PRNGKey(0)
    raw = init_raw_params(jax.random.fold_in(root, 1))
    wmat, vecs = pack_params(raw)
    img = jax.random.normal(jax.random.fold_in(root, 2),
                            (BATCH, CHANNELS, IMAGE_SIZE, IMAGE_SIZE),
                            dtype=jnp.float32)

    logits = jax.jit(vit_forward)(img, wmat, vecs)
    logits = jax.block_until_ready(logits)
    assert logits.shape == (BATCH, NUM_CLASSES)
    assert bool(jnp.all(jnp.isfinite(logits)))

    with jax.default_matmul_precision("float32"):
        ref = vit_reference(img, raw)
    assert bool(jnp.allclose(logits, ref, rtol=2e-2, atol=2e-2)), \
        "kernel output does not match the plain-JAX reference"

    print("KERNEL_OK")
</pallas_src>

<mosaic_0001>
module attributes {stable_mosaic.version = 11 : i64} {
  func.func @vit_kernel(%arg0: memref<48x48xf32, #tpu.memory_space<vmem>>, %arg1: memref<888x64xf32, #tpu.memory_space<vmem>>, %arg2: memref<40x64xf32, #tpu.memory_space<vmem>>, %arg3: memref<2x10xf32, #tpu.memory_space<vmem>>) attributes {dimension_semantics = [], scalar_prefetch = 0 : i64, scratch_operands = 0 : i64, tpu.core_type = #tpu.core_type<tc>} {
    %c0 = arith.constant 0 : index
    %c0_0 = arith.constant 0 : index
    %0 = vector.load %arg1[%c0, %c0_0] : memref<888x64xf32, #tpu.memory_space<vmem>>, vector<48x32xf32>
    %c48 = arith.constant 48 : index
    %c0_1 = arith.constant 0 : index
    %1 = vector.load %arg1[%c48, %c0_1] : memref<888x64xf32, #tpu.memory_space<vmem>>, vector<48x32xf32>
    %c96 = arith.constant 96 : index
    %c0_2 = arith.constant 0 : index
    %2 = vector.load %arg1[%c96, %c0_2] : memref<888x64xf32, #tpu.memory_space<vmem>>, vector<48x48xf32>
    %c144 = arith.constant 144 : index
    %c0_3 = arith.constant 0 : index
    %3 = vector.load %arg1[%c144, %c0_3] : memref<888x64xf32, #tpu.memory_space<vmem>>, vector<64x64xf32>
    %c0_4 = arith.constant 0 : index
    %c0_5 = arith.constant 0 : index
    %4 = vector.load %arg0[%c0_4, %c0_5] : memref<48x48xf32, #tpu.memory_space<vmem>>, vector<48x48xf32>
    %cst = arith.constant dense<0.000000e+00> : vector<48x32xf32>
    %5 = tpu.matmul %4, %0, %cst {dimension_numbers = #tpu.dot_dimension_numbers<[1], [0], [0], [1], [0, 0, 1, 1], [], []>} : vector<48x48xf32>, vector<48x32xf32>, vector<48x32xf32> -> vector<48x32xf32>
    %6 = arith.addf %5, %1 : vector<48x32xf32>
    %c248 = arith.constant 248 : index
    %c0_6 = arith.constant 0 : index
    %7 = vector.load %arg1[%c248, %c0_6] : memref<888x64xf32, #tpu.memory_space<vmem>>, vector<32x64xf32>
    %c280 = arith.constant 280 : index
    %c0_7 = arith.constant 0 : index
    %8 = vector.load %arg1[%c280, %c0_7] : memref<888x64xf32, #tpu.memory_space<vmem>>, vector<64x64xf32>
    %c344 = arith.constant 344 : index
    %c0_8 = arith.constant 0 : index
    %9 = vector.load %arg1[%c344, %c0_8] : memref<888x64xf32, #tpu.memory_space<vmem>>, vector<64x64xf32>
    %c408 = arith.constant 408 : index
    %c0_9 = arith.constant 0 : index
    %10 = vector.load %arg1[%c408, %c0_9] : memref<888x64xf32, #tpu.memory_space<vmem>>, vector<64x32xf32>
    %c472 = arith.constant 472 : index
    %c0_10 = arith.constant 0 : index
    %11 = vector.load %arg1[%c472, %c0_10] : memref<888x64xf32, #tpu.memory_space<vmem>>, vector<32x64xf32>
    %c504 = arith.constant 504 : index
    %c0_11 = arith.constant 0 : index
    %12 = vector.load %arg1[%c504, %c0_11] : memref<888x64xf32, #tpu.memory_space<vmem>>, vector<64x32xf32>
    %c0_12 = arith.constant 0 : index
    %c0_13 = arith.constant 0 : index
    %13 = vector.load %arg2[%c0_12, %c0_13] : memref<40x64xf32, #tpu.memory_space<vmem>>, vector<1x64xf32>
    %c1 = arith.constant 1 : index
    %c0_14 = arith.constant 0 : index
    %14 = vector.load %arg2[%c1, %c0_14] : memref<40x64xf32, #tpu.memory_space<vmem>>, vector<1x64xf32>
    %c2 = arith.constant 2 : index
    %c0_15 = arith.constant 0 : index
    %15 = vector.load %arg2[%c2, %c0_15] : memref<40x64xf32, #tpu.memory_space<vmem>>, vector<1x64xf32>
    %c3 = arith.constant 3 : index
    %c0_16 = arith.constant 0 : index
    %16 = vector.load %arg2[%c3, %c0_16] : memref<40x64xf32, #tpu.memory_space<vmem>>, vector<1x32xf32>
    %c4 = arith.constant 4 : index
    %c0_17 = arith.constant 0 : index
    %17 = vector.load %arg2[%c4, %c0_17] : memref<40x64xf32, #tpu.memory_space<vmem>>, vector<1x64xf32>
    %c5 = arith.constant 5 : index
    %c0_18 = arith.constant 0 : index
    %18 = vector.load %arg2[%c5, %c0_18] : memref<40x64xf32, #tpu.memory_space<vmem>>, vector<1x32xf32>
    %c6 = arith.constant 6 : index
    %c0_19 = arith.constant 0 : index
    %19 = vector.load %arg2[%c6, %c0_19] : memref<40x64xf32, #tpu.memory_space<vmem>>, vector<1x32xf32>
    %c7 = arith.constant 7 : index
    %c0_20 = arith.constant 0 : index
    %20 = vector.load %arg2[%c7, %c0_20] : memref<40x64xf32, #tpu.memory_space<vmem>>, vector<1x32xf32>
    %c8 = arith.constant 8 : index
    %c0_21 = arith.constant 0 : index
    %21 = vector.load %arg2[%c8, %c0_21] : memref<40x64xf32, #tpu.memory_space<vmem>>, vector<1x32xf32>
    %c9 = arith.constant 9 : index
    %c0_22 = arith.constant 0 : index
    %22 = vector.load %arg2[%c9, %c0_22] : memref<40x64xf32, #tpu.memory_space<vmem>>, vector<1x32xf32>
    %cst_23 = arith.constant dense<0.000000e+00> : vector<48x32xf32>
    %23 = tpu.matmul %2, %6, %cst_23 {dimension_numbers = #tpu.dot_dimension_numbers<[1], [0], [0], [1], [0, 0, 1, 1], [], []>} : vector<48x48xf32>, vector<48x32xf32>, vector<48x32xf32> -> vector<48x32xf32>
    %24 = tpu.concatenate %6, %23 in 1 : vector<48x32xf32>, vector<48x32xf32> -> vector<48x64xf32>
    %cst_24 = arith.constant dense<0.000000e+00> : vector<48x64xf32>
    %25 = tpu.matmul %6, %7, %cst_24 {dimension_numbers = #tpu.dot_dimension_numbers<[1], [0], [0], [1], [0, 0, 1, 1], [], []>} : vector<48x32xf32>, vector<32x64xf32>, vector<48x64xf32> -> vector<48x64xf32>
    %26 = vector.broadcast %13 : vector<1x64xf32> to vector<48x64xf32>
    %27 = arith.addf %25, %26 : vector<48x64xf32>
    %cst_25 = arith.constant dense<0.000000e+00> : vector<48x64xf32>
    %28 = tpu.matmul %24, %8, %cst_25 {dimension_numbers = #tpu.dot_dimension_numbers<[1], [0], [0], [1], [0, 0, 1, 1], [], []>} : vector<48x64xf32>, vector<64x64xf32>, vector<48x64xf32> -> vector<48x64xf32>
    %29 = vector.broadcast %14 : vector<1x64xf32> to vector<48x64xf32>
    %30 = arith.addf %28, %29 : vector<48x64xf32>
    %cst_26 = arith.constant dense<0.000000e+00> : vector<48x64xf32>
    %31 = tpu.matmul %24, %9, %cst_26 {dimension_numbers = #tpu.dot_dimension_numbers<[1], [0], [0], [1], [0, 0, 1, 1], [], []>} : vector<48x64xf32>, vector<64x64xf32>, vector<48x64xf32> -> vector<48x64xf32>
    %32 = vector.broadcast %15 : vector<1x64xf32> to vector<48x64xf32>
    %33 = arith.addf %31, %32 : vector<48x64xf32>
    %34 = arith.mulf %27, %30 : vector<48x64xf32>
    %cst_27 = arith.constant dense<0.000000e+00> : vector<48x64xf32>
    %35 = tpu.matmul %34, %3, %cst_27 {dimension_numbers = #tpu.dot_dimension_numbers<[1], [0], [0], [1], [0, 0, 1, 1], [], []>} : vector<48x64xf32>, vector<64x64xf32>, vector<48x64xf32> -> vector<48x64xf32>
    %36 = math.exp %35 : vector<48x64xf32>
    %cst_28 = arith.constant 1.000000e+00 : f32
    %37 = vector.broadcast %cst_28 : f32 to vector<48x64xf32>
    %38 = arith.addf %37, %36 : vector<48x64xf32>
    %39 = tpu.reciprocal %38 : vector<48x64xf32> -> vector<48x64xf32>
    %40 = arith.mulf %39, %33 : vector<48x64xf32>
    %cst_29 = arith.constant dense<0.000000e+00> : vector<48x32xf32>
    %41 = tpu.matmul %40, %10, %cst_29 {dimension_numbers = #tpu.dot_dimension_numbers<[1], [0], [0], [1], [0, 0, 1, 1], [], []>} : vector<48x64xf32>, vector<64x32xf32>, vector<48x32xf32> -> vector<48x32xf32>
    %42 = arith.addf %6, %41 : vector<48x32xf32>
    %43 = vector.broadcast %16 : vector<1x32xf32> to vector<48x32xf32>
    %44 = arith.addf %42, %43 : vector<48x32xf32>
    %cst_30 = arith.constant dense<0.000000e+00> : vector<48xf32>
    %45 = vector.multi_reduction <add>, %44, %cst_30 [1] : vector<48x32xf32> to vector<48xf32>
    %46 = vector.shape_cast %45 : vector<48xf32> to vector<48x1xf32>
    %cst_31 = arith.constant 3.200000e+01 : f32
    %47 = vector.broadcast %cst_31 : f32 to vector<48x1xf32>
    %48 = arith.divf %46, %47 : vector<48x1xf32>
    %49 = vector.broadcast %48 : vector<48x1xf32> to vector<48x32xf32>
    %50 = arith.subf %44, %49 : vector<48x32xf32>
    %51 = arith.mulf %50, %50 : vector<48x32xf32>
    %cst_32 = arith.constant dense<0.000000e+00> : vector<48xf32>
    %52 = vector.multi_reduction <add>, %51, %cst_32 [1] : vector<48x32xf32> to vector<48xf32>
    %53 = vector.shape_cast %52 : vector<48xf32> to vector<48x1xf32>
    %cst_33 = arith.constant 3.200000e+01 : f32
    %54 = vector.broadcast %cst_33 : f32 to vector<48x1xf32>
    %55 = arith.divf %53, %54 : vector<48x1xf32>
    %cst_34 = arith.constant 9.99999974E-6 : f32
    %56 = vector.broadcast %cst_34 : f32 to vector<48x1xf32>
    %57 = arith.addf %55, %56 : vector<48x1xf32>
    %58 = math.rsqrt %57 : vector<48x1xf32>
    %59 = vector.broadcast %58 : vector<48x1xf32> to vector<48x32xf32>
    %60 = arith.mulf %50, %59 : vector<48x32xf32>
    %61 = vector.broadcast %19 : vector<1x32xf32> to vector<48x32xf32>
    %62 = arith.mulf %60, %61 : vector<48x32xf32>
    %63 = vector.broadcast %20 : vector<1x32xf32> to vector<48x32xf32>
    %64 = arith.addf %62, %63 : vector<48x32xf32>
    %cst_35 = arith.constant dense<0.000000e+00> : vector<48x64xf32>
    %65 = tpu.matmul %64, %11, %cst_35 {dimension_numbers = #tpu.dot_dimension_numbers<[1], [0], [0], [1], [0, 0, 1, 1], [], []>} : vector<48x32xf32>, vector<32x64xf32>, vector<48x64xf32> -> vector<48x64xf32>
    %66 = vector.broadcast %17 : vector<1x64xf32> to vector<48x64xf32>
    %67 = arith.addf %65, %66 : vector<48x64xf32>
    %cst_36 = arith.constant 0.000000e+00 : f32
    %68 = vector.broadcast %cst_36 : f32 to vector<48x64xf32>
    %69 = arith.maximumf %67, %68 : vector<48x64xf32>
    %cst_37 = arith.constant dense<0.000000e+00> : vector<48x32xf32>
    %70 = tpu.matmul %69, %12, %cst_37 {dimension_numbers = #tpu.dot_dimension_numbers<[1], [0], [0], [1], [0, 0, 1, 1], [], []>} : vector<48x64xf32>, vector<64x32xf32>, vector<48x32xf32> -> vector<48x32xf32>
    %71 = arith.addf %64, %70 : vector<48x32xf32>
    %72 = vector.broadcast %18 : vector<1x32xf32> to vector<48x32xf32>
    %73 = arith.addf %71, %72 : vector<48x32xf32>
    %cst_38 = arith.constant dense<0.000000e+00> : vector<48xf32>
    %74 = vector.multi_reduction <add>, %73, %cst_38 [1] : vector<48x32xf32> to vector<48xf32>
    %75 = vector.shape_cast %74 : vector<48xf32> to vector<48x1xf32>
    %cst_39 = arith.constant 3.200000e+01 : f32
    %76 = vector.broadcast %cst_39 : f32 to vector<48x1xf32>
    %77 = arith.divf %75, %76 : vector<48x1xf32>
    %78 = vector.broadcast %77 : vector<48x1xf32> to vector<48x32xf32>
    %79 = arith.subf %73, %78 : vector<48x32xf32>
    %80 = arith.mulf %79, %79 : vector<48x32xf32>
    %cst_40 = arith.constant dense<0.000000e+00> : vector<48xf32>
    %81 = vector.multi_reduction <add>, %80, %cst_40 [1] : vector<48x32xf32> to vector<48xf32>
    %82 = vector.shape_cast %81 : vector<48xf32> to vector<48x1xf32>
    %cst_41 = arith.constant 3.200000e+01 : f32
    %83 = vector.broadcast %cst_41 : f32 to vector<48x1xf32>
    %84 = arith.divf %82, %83 : vector<48x1xf32>
    %cst_42 = arith.constant 9.99999974E-6 : f32
    %85 = vector.broadcast %cst_42 : f32 to vector<48x1xf32>
    %86 = arith.addf %84, %85 : vector<48x1xf32>
    %87 = math.rsqrt %86 : vector<48x1xf32>
    %88 = vector.broadcast %87 : vector<48x1xf32> to vector<48x32xf32>
    %89 = arith.mulf %79, %88 : vector<48x32xf32>
    %90 = vector.broadcast %21 : vector<1x32xf32> to vector<48x32xf32>
    %91 = arith.mulf %89, %90 : vector<48x32xf32>
    %92 = vector.broadcast %22 : vector<1x32xf32> to vector<48x32xf32>
    %93 = arith.addf %91, %92 : vector<48x32xf32>
    %c568 = arith.constant 568 : index
    %c0_43 = arith.constant 0 : index
    %94 = vector.load %arg1[%c568, %c0_43] : memref<888x64xf32, #tpu.memory_space<vmem>>, vector<32x64xf32>
    %c600 = arith.constant 600 : index
    %c0_44 = arith.constant 0 : index
    %95 = vector.load %arg1[%c600, %c0_44] : memref<888x64xf32, #tpu.memory_space<vmem>>, vector<64x64xf32>
    %c664 = arith.constant 664 : index
    %c0_45 = arith.constant 0 : index
    %96 = vector.load %arg1[%c664, %c0_45] : memref<888x64xf32, #tpu.memory_space<vmem>>, vector<64x64xf32>
    %c728 = arith.constant 728 : index
    %c0_46 = arith.constant 0 : index
    %97 = vector.load %arg1[%c728, %c0_46] : memref<888x64xf32, #tpu.memory_space<vmem>>, vector<64x32xf32>
    %c792 = arith.constant 792 : index
    %c0_47 = arith.constant 0 : index
    %98 = vector.load %arg1[%c792, %c0_47] : memref<888x64xf32, #tpu.memory_space<vmem>>, vector<32x64xf32>
    %c824 = arith.constant 824 : index
    %c0_48 = arith.constant 0 : index
    %99 = vector.load %arg1[%c824, %c0_48] : memref<888x64xf32, #tpu.memory_space<vmem>>, vector<64x32xf32>
    %c16 = arith.constant 16 : index
    %c0_49 = arith.constant 0 : index
    %100 = vector.load %arg2[%c16, %c0_49] : memref<40x64xf32, #tpu.memory_space<vmem>>, vector<1x64xf32>
    %c17 = arith.constant 17 : index
    %c0_50 = arith.constant 0 : index
    %101 = vector.load %arg2[%c17, %c0_50] : memref<40x64xf32, #tpu.memory_space<vmem>>, vector<1x64xf32>
    %c18 = arith.constant 18 : index
    %c0_51 = arith.constant 0 : index
    %102 = vector.load %arg2[%c18, %c0_51] : memref<40x64xf32, #tpu.memory_space<vmem>>, vector<1x64xf32>
    %c19 = arith.constant 19 : index
    %c0_52 = arith.constant 0 : index
    %103 = vector.load %arg2[%c19, %c0_52] : memref<40x64xf32, #tpu.memory_space<vmem>>, vector<1x32xf32>
    %c20 = arith.constant 20 : index
    %c0_53 = arith.constant 0 : index
    %104 = vector.load %arg2[%c20, %c0_53] : memref<40x64xf32, #tpu.memory_space<vmem>>, vector<1x64xf32>
    %c21 = arith.constant 21 : index
    %c0_54 = arith.constant 0 : index
    %105 = vector.load %arg2[%c21, %c0_54] : memref<40x64xf32, #tpu.memory_space<vmem>>, vector<1x32xf32>
    %c22 = arith.constant 22 : index
    %c0_55 = arith.constant 0 : index
    %106 = vector.load %arg2[%c22, %c0_55] : memref<40x64xf32, #tpu.memory_space<vmem>>, vector<1x32xf32>
    %c23 = arith.constant 23 : index
    %c0_56 = arith.constant 0 : index
    %107 = vector.load %arg2[%c23, %c0_56] : memref<40x64xf32, #tpu.memory_space<vmem>>, vector<1x32xf32>
    %c24 = arith.constant 24 : index
    %c0_57 = arith.constant 0 : index
    %108 = vector.load %arg2[%c24, %c0_57] : memref<40x64xf32, #tpu.memory_space<vmem>>, vector<1x32xf32>
    %c25 = arith.constant 25 : index
    %c0_58 = arith.constant 0 : index
    %109 = vector.load %arg2[%c25, %c0_58] : memref<40x64xf32, #tpu.memory_space<vmem>>, vector<1x32xf32>
    %cst_59 = arith.constant dense<0.000000e+00> : vector<48x32xf32>
    %110 = tpu.matmul %2, %93, %cst_59 {dimension_numbers = #tpu.dot_dimension_numbers<[1], [0], [0], [1], [0, 0, 1, 1], [], []>} : vector<48x48xf32>, vector<48x32xf32>, vector<48x32xf32> -> vector<48x32xf32>
    %111 = tpu.concatenate %93, %110 in 1 : vector<48x32xf32>, vector<48x32xf32> -> vector<48x64xf32>
    %cst_60 = arith.constant dense<0.000000e+00> : vector<48x64xf32>
    %112 = tpu.matmul %93, %94, %cst_60 {dimension_numbers = #tpu.dot_dimension_numbers<[1], [0], [0], [1], [0, 0, 1, 1], [], []>} : vector<48x32xf32>, vector<32x64xf32>, vector<48x64xf32> -> vector<48x64xf32>
    %113 = vector.broadcast %100 : vector<1x64xf32> to vector<48x64xf32>
    %114 = arith.addf %112, %113 : vector<48x64xf32>
    %cst_61 = arith.constant dense<0.000000e+00> : vector<48x64xf32>
    %115 = tpu.matmul %111, %95, %cst_61 {dimension_numbers = #tpu.dot_dimension_numbers<[1], [0], [0], [1], [0, 0, 1, 1], [], []>} : vector<48x64xf32>, vector<64x64xf32>, vector<48x64xf32> -> vector<48x64xf32>
    %116 = vector.broadcast %101 : vector<1x64xf32> to vector<48x64xf32>
    %117 = arith.addf %115, %116 : vector<48x64xf32>
    %cst_62 = arith.constant dense<0.000000e+00> : vector<48x64xf32>
    %118 = tpu.matmul %111, %96, %cst_62 {dimension_numbers = #tpu.dot_dimension_numbers<[1], [0], [0], [1], [0, 0, 1, 1], [], []>} : vector<48x64xf32>, vector<64x64xf32>, vector<48x64xf32> -> vector<48x64xf32>
    %119 = vector.broadcast %102 : vector<1x64xf32> to vector<48x64xf32>
    %120 = arith.addf %118, %119 : vector<48x64xf32>
    %121 = arith.mulf %114, %117 : vector<48x64xf32>
    %cst_63 = arith.constant dense<0.000000e+00> : vector<48x64xf32>
    %122 = tpu.matmul %121, %3, %cst_63 {dimension_numbers = #tpu.dot_dimension_numbers<[1], [0], [0], [1], [0, 0, 1, 1], [], []>} : vector<48x64xf32>, vector<64x64xf32>, vector<48x64xf32> -> vector<48x64xf32>
    %123 = math.exp %122 : vector<48x64xf32>
    %cst_64 = arith.constant 1.000000e+00 : f32
    %124 = vector.broadcast %cst_64 : f32 to vector<48x64xf32>
    %125 = arith.addf %124, %123 : vector<48x64xf32>
    %126 = tpu.reciprocal %125 : vector<48x64xf32> -> vector<48x64xf32>
    %127 = arith.mulf %126, %120 : vector<48x64xf32>
    %cst_65 = arith.constant dense<0.000000e+00> : vector<48x32xf32>
    %128 = tpu.matmul %127, %97, %cst_65 {dimension_numbers = #tpu.dot_dimension_numbers<[1], [0], [0], [1], [0, 0, 1, 1], [], []>} : vector<48x64xf32>, vector<64x32xf32>, vector<48x32xf32> -> vector<48x32xf32>
    %129 = arith.addf %93, %128 : vector<48x32xf32>
    %130 = vector.broadcast %103 : vector<1x32xf32> to vector<48x32xf32>
    %131 = arith.addf %129, %130 : vector<48x32xf32>
    %cst_66 = arith.constant dense<0.000000e+00> : vector<48xf32>
    %132 = vector.multi_reduction <add>, %131, %cst_66 [1] : vector<48x32xf32> to vector<48xf32>
    %133 = vector.shape_cast %132 : vector<48xf32> to vector<48x1xf32>
    %cst_67 = arith.constant 3.200000e+01 : f32
    %134 = vector.broadcast %cst_67 : f32 to vector<48x1xf32>
    %135 = arith.divf %133, %134 : vector<48x1xf32>
    %136 = vector.broadcast %135 : vector<48x1xf32> to vector<48x32xf32>
    %137 = arith.subf %131, %136 : vector<48x32xf32>
    %138 = arith.mulf %137, %137 : vector<48x32xf32>
    %cst_68 = arith.constant dense<0.000000e+00> : vector<48xf32>
    %139 = vector.multi_reduction <add>, %138, %cst_68 [1] : vector<48x32xf32> to vector<48xf32>
    %140 = vector.shape_cast %139 : vector<48xf32> to vector<48x1xf32>
    %cst_69 = arith.constant 3.200000e+01 : f32
    %141 = vector.broadcast %cst_69 : f32 to vector<48x1xf32>
    %142 = arith.divf %140, %141 : vector<48x1xf32>
    %cst_70 = arith.constant 9.99999974E-6 : f32
    %143 = vector.broadcast %cst_70 : f32 to vector<48x1xf32>
    %144 = arith.addf %142, %143 : vector<48x1xf32>
    %145 = math.rsqrt %144 : vector<48x1xf32>
    %146 = vector.broadcast %145 : vector<48x1xf32> to vector<48x32xf32>
    %147 = arith.mulf %137, %146 : vector<48x32xf32>
    %148 = vector.broadcast %106 : vector<1x32xf32> to vector<48x32xf32>
    %149 = arith.mulf %147, %148 : vector<48x32xf32>
    %150 = vector.broadcast %107 : vector<1x32xf32> to vector<48x32xf32>
    %151 = arith.addf %149, %150 : vector<48x32xf32>
    %cst_71 = arith.constant dense<0.000000e+00> : vector<48x64xf32>
    %152 = tpu.matmul %151, %98, %cst_71 {dimension_numbers = #tpu.dot_dimension_numbers<[1], [0], [0], [1], [0, 0, 1, 1], [], []>} : vector<48x32xf32>, vector<32x64xf32>, vector<48x64xf32> -> vector<48x64xf32>
    %153 = vector.broadcast %104 : vector<1x64xf32> to vector<48x64xf32>
    %154 = arith.addf %152, %153 : vector<48x64xf32>
    %cst_72 = arith.constant 0.000000e+00 : f32
    %155 = vector.broadcast %cst_72 : f32 to vector<48x64xf32>
    %156 = arith.maximumf %154, %155 : vector<48x64xf32>
    %cst_73 = arith.constant dense<0.000000e+00> : vector<48x32xf32>
    %157 = tpu.matmul %156, %99, %cst_73 {dimension_numbers = #tpu.dot_dimension_numbers<[1], [0], [0], [1], [0, 0, 1, 1], [], []>} : vector<48x64xf32>, vector<64x32xf32>, vector<48x32xf32> -> vector<48x32xf32>
    %158 = arith.addf %151, %157 : vector<48x32xf32>
    %159 = vector.broadcast %105 : vector<1x32xf32> to vector<48x32xf32>
    %160 = arith.addf %158, %159 : vector<48x32xf32>
    %cst_74 = arith.constant dense<0.000000e+00> : vector<48xf32>
    %161 = vector.multi_reduction <add>, %160, %cst_74 [1] : vector<48x32xf32> to vector<48xf32>
    %162 = vector.shape_cast %161 : vector<48xf32> to vector<48x1xf32>
    %cst_75 = arith.constant 3.200000e+01 : f32
    %163 = vector.broadcast %cst_75 : f32 to vector<48x1xf32>
    %164 = arith.divf %162, %163 : vector<48x1xf32>
    %165 = vector.broadcast %164 : vector<48x1xf32> to vector<48x32xf32>
    %166 = arith.subf %160, %165 : vector<48x32xf32>
    %167 = arith.mulf %166, %166 : vector<48x32xf32>
    %cst_76 = arith.constant dense<0.000000e+00> : vector<48xf32>
    %168 = vector.multi_reduction <add>, %167, %cst_76 [1] : vector<48x32xf32> to vector<48xf32>
    %169 = vector.shape_cast %168 : vector<48xf32> to vector<48x1xf32>
    %cst_77 = arith.constant 3.200000e+01 : f32
    %170 = vector.broadcast %cst_77 : f32 to vector<48x1xf32>
    %171 = arith.divf %169, %170 : vector<48x1xf32>
    %cst_78 = arith.constant 9.99999974E-6 : f32
    %172 = vector.broadcast %cst_78 : f32 to vector<48x1xf32>
    %173 = arith.addf %171, %172 : vector<48x1xf32>
    %174 = math.rsqrt %173 : vector<48x1xf32>
    %175 = vector.broadcast %174 : vector<48x1xf32> to vector<48x32xf32>
    %176 = arith.mulf %166, %175 : vector<48x32xf32>
    %177 = vector.broadcast %108 : vector<1x32xf32> to vector<48x32xf32>
    %178 = arith.mulf %176, %177 : vector<48x32xf32>
    %179 = vector.broadcast %109 : vector<1x32xf32> to vector<48x32xf32>
    %180 = arith.addf %178, %179 : vector<48x32xf32>
    %c208 = arith.constant 208 : index
    %c0_79 = arith.constant 0 : index
    %181 = vector.load %arg1[%c208, %c0_79] : memref<888x64xf32, #tpu.memory_space<vmem>>, vector<8x48xf32>
    %c216 = arith.constant 216 : index
    %c0_80 = arith.constant 0 : index
    %182 = vector.load %arg1[%c216, %c0_80] : memref<888x64xf32, #tpu.memory_space<vmem>>, vector<32x10xf32>
    %c32 = arith.constant 32 : index
    %c0_81 = arith.constant 0 : index
    %183 = vector.load %arg2[%c32, %c0_81] : memref<40x64xf32, #tpu.memory_space<vmem>>, vector<1x32xf32>
    %c33 = arith.constant 33 : index
    %c0_82 = arith.constant 0 : index
    %184 = vector.load %arg2[%c33, %c0_82] : memref<40x64xf32, #tpu.memory_space<vmem>>, vector<1x32xf32>
    %c34 = arith.constant 34 : index
    %c0_83 = arith.constant 0 : index
    %185 = vector.load %arg2[%c34, %c0_83] : memref<40x64xf32, #tpu.memory_space<vmem>>, vector<1x10xf32>
    %cst_84 = arith.constant dense<0.000000e+00> : vector<8x32xf32>
    %186 = tpu.matmul %181, %180, %cst_84 {dimension_numbers = #tpu.dot_dimension_numbers<[1], [0], [0], [1], [0, 0, 1, 1], [], []>} : vector<8x48xf32>, vector<48x32xf32>, vector<8x32xf32> -> vector<8x32xf32>
    %cst_85 = arith.constant dense<0.000000e+00> : vector<8xf32>
    %187 = vector.multi_reduction <add>, %186, %cst_85 [1] : vector<8x32xf32> to vector<8xf32>
    %188 = vector.shape_cast %187 : vector<8xf32> to vector<8x1xf32>
    %cst_86 = arith.constant 3.200000e+01 : f32
    %189 = vector.broadcast %cst_86 : f32 to vector<8x1xf32>
    %190 = arith.divf %188, %189 : vector<8x1xf32>
    %191 = vector.broadcast %190 : vector<8x1xf32> to vector<8x32xf32>
    %192 = arith.subf %186, %191 : vector<8x32xf32>
    %193 = arith.mulf %192, %192 : vector<8x32xf32>
    %cst_87 = arith.constant dense<0.000000e+00> : vector<8xf32>
    %194 = vector.multi_reduction <add>, %193, %cst_87 [1] : vector<8x32xf32> to vector<8xf32>
    %195 = vector.shape_cast %194 : vector<8xf32> to vector<8x1xf32>
    %cst_88 = arith.constant 3.200000e+01 : f32
    %196 = vector.broadcast %cst_88 : f32 to vector<8x1xf32>
    %197 = arith.divf %195, %196 : vector<8x1xf32>
    %cst_89 = arith.constant 9.99999974E-6 : f32
    %198 = vector.broadcast %cst_89 : f32 to vector<8x1xf32>
    %199 = arith.addf %197, %198 : vector<8x1xf32>
    %200 = math.rsqrt %199 : vector<8x1xf32>
    %201 = vector.broadcast %200 : vector<8x1xf32> to vector<8x32xf32>
    %202 = arith.mulf %192, %201 : vector<8x32xf32>
    %203 = vector.broadcast %183 : vector<1x32xf32> to vector<8x32xf32>
    %204 = arith.mulf %202, %203 : vector<8x32xf32>
    %205 = vector.broadcast %184 : vector<1x32xf32> to vector<8x32xf32>
    %206 = arith.addf %204, %205 : vector<8x32xf32>
    %cst_90 = arith.constant dense<0.000000e+00> : vector<8x10xf32>
    %207 = tpu.matmul %206, %182, %cst_90 {dimension_numbers = #tpu.dot_dimension_numbers<[1], [0], [0], [1], [0, 0, 1, 1], [], []>} : vector<8x32xf32>, vector<32x10xf32>, vector<8x10xf32> -> vector<8x10xf32>
    %208 = vector.broadcast %185 : vector<1x10xf32> to vector<8x10xf32>
    %209 = arith.addf %207, %208 : vector<8x10xf32>
    %210 = vector.extract_strided_slice %209 {offsets = [0, 0], sizes = [2, 10], strides = [1, 1]} : vector<8x10xf32> to vector<2x10xf32>
    %c0_91 = arith.constant 0 : index
    %c0_92 = arith.constant 0 : index
    %211 = vector.load %arg3[%c0_91, %c0_92] : memref<2x10xf32, #tpu.memory_space<vmem>>, vector<2x10xf32>
    tpu.vector_store %arg3[%c0_91, %c0_92], %210 {strides = array<i32>} : memref<2x10xf32, #tpu.memory_space<vmem>>, vector<2x10xf32>,
    return
  }
}

</mosaic_0001>

<bundles_post_ra>
// kernel: vit_forward.1
= control target key start
LH: loop header
LB: loop body
LE: loop exit
PB: predicated region body
PF: predicated region fallthrough
CT: control target
= control target key end

     0   :  { %vm47_vm0 = vcmask 392192   ;;  %s4867_s0 = inlined_call_operand.vmem [shape: f32[48,48], index: 0, kind: input, shape index: {}]   ;;  %s4868_s1 = inlined_call_operand.vmem [shape: f32[888,64], index: 1, kind: input, shape index: {}]   ;;  %s4869_s2 = inlined_call_operand.vmem [shape: f32[40,64], index: 2, kind: input, shape index: {}]   ;;  %s4870_s3 = inlined_call_operand.hbm [shape: f32[2,10], index: 3, kind: output, shape index: {}]  }
   0x1   :  { %v15_v0 = vld [vmem:[%s4868_s1] sm:$0xff]  ;;  %v16_v1 = vld [vmem:[%s4868_s1 + $0x8] sm:$0xff]  ;;  %v17_v2 = vld [vmem:[%s4868_s1 + $0x10] sm:$0xff] }
   0x2   :  { %v3609_v3 = vpack.c.bf16 %v16_v1, %v15_v0  ;;  %v18_v4 = vld [vmem:[%s4868_s1 + $0x18] sm:$0xff]  ;;  %v19_v6 = vld [vmem:[%s4868_s1 + $0x20] sm:$0xff]  ;;  %v20_v7 = vld [vmem:[%s4868_s1 + $0x28] sm:$0xff] }
   0x3   :  { %v3613_v5 = vpack.c.bf16 %v18_v4, %v17_v2  ;;  %v41_v8 = vld [vmem:[%s4867_s0] sm:$0xff]  ;;  %v3617_v9 = vpack.c.bf16 %v20_v7, %v19_v6 }
   0x4   :  { %3610 = vmatprep.subr.bf16.mxu0 %v3609_v3  ;;  %3214 = vmatprep.mubr.msk.f32.mxu0 %vm47_vm0, %v41_v8 }
   0x5   :  { %3612 = vmatpush3.bf16.msra.mxu0 %v3609_v3 }
   0x6   :  { %3614 = vmatprep.subr.bf16.mxu0 %v3613_v5 }
   0x7   :  { %8 = vsyncpa [#allocation3], 0  ;;  %v161_v10 = vld [vmem:[%s4868_s1 + $0xf8] sm:$0xff]  ;;  %v162_v11 = vld [vmem:[%s4868_s1 + $0x100] sm:$0xff]  ;;  %vm348_vm1 = vcmask 261120   ;;  %s3984_s17 = smov 32  }
   0x8   :  { %v3633_v12 = vpack.c.bf16 %v162_v11, %v161_v10  ;;  %v42_v13 = vld [vmem:[%s4867_s0 + $0x8] sm:$0xff]  ;;  %v43_v14 = vld [vmem:[%s4867_s0 + $0x10] sm:$0xff]  ;;  %v44_v15 = vld [vmem:[%s4867_s0 + $0x18] sm:$0xff]  ;;  %vm476_vm2 = vcmask 523264   ;;  %vm3986_vm3 = vmmov 0   ;;  %s3988_s26 = smov [#allocation2]  }
   0x9   :  { %3616 = vmatpush3.bf16.msra.mxu0 %v3613_v5  ;;  %v45_v16 = vld [vmem:[%s4867_s0 + $0x20] sm:$0xff]  ;;  %v46_v17 = vld [vmem:[%s4867_s0 + $0x28] sm:$0xff]  ;;  %v164_v19 = vld [vmem:[%s4868_s1 + $0x110] sm:$0xff]  ;;  %s2839_s27 = sshll.u32 %s3988_s26, 4  ;;  %vm2831_vm4 = vcmask 74752   ;;  %s2840_s27 = int_to_ptr.vmem [resolvable:$true] %s2839_s27 }
   0xa   :  { %3618 = vmatprep.subr.bf16.mxu0 %v3617_v9  ;;  %v163_v18 = vld [vmem:[%s4868_s1 + $0x108] sm:$0xff]  ;;  %v4066_v21 = vld [vmem:[%s4868_s1 + $0x60] sm:$0xff]  ;;  %v22_v22 = vld [vmem:[%s4868_s1 + $0x38] sm:$0xff]  ;;  %s3960_s28 = scalar_lea.vmem %s2840_s27, 32  ;;  %p3965_p1 = scmp.lt.s32.totalorder %s2840_s27, %s2840_s27 }
   0xb   :  { %v3637_v20 = vpack.c.bf16 %v164_v19, %v163_v18  ;;  %3235 = vmatprep.mubr.msk.f32.mxu1 %vm47_vm0, %v4066_v21  ;;  %v21_v23 = vld [vmem:[%s4868_s1 + $0x30] sm:$0xff]  ;;  %v24_v28 = vld [vmem:[%s4868_s1 + $0x48] sm:$0xff]  ;;  %v23_v29 = vld [vmem:[%s4868_s1 + $0x40] sm:$0xff]  ;;  %p3961_p0 = scmp.ne.s32.totalorder %s2840_s27, %s3960_s28  ;;  %p3966_p2 = scmp.lt.s32.totalorder %s3960_s28, %s3960_s28 }
   0xc   :  { %v26_v35 = vld [vmem:[%s4868_s1 + $0x58] sm:$0xff]  ;;  %v25_v36 = vld [vmem:[%s4868_s1 + $0x50] sm:$0xff]  ;;  %v28_v43 = vld [vmem:[%s4868_s1 + $0x68] sm:$0xff] }
   0xd   :  { %3620 = vmatpush3.bf16.msra.mxu0 %v3617_v9  ;;  %v29_v44 = vld [vmem:[%s4868_s1 + $0x70] sm:$0xff]  ;;  %v30_v45 = vld [vmem:[%s4868_s1 + $0x78] sm:$0xff]  ;;  %v31_v46 = vld [vmem:[%s4868_s1 + $0x80] sm:$0xff]  ;;  %p3967_p3 = por %p3966_p2, %p3965_p1 }
   0xe   :  { %3634 = vmatprep.subr.bf16.mxu0 %v3633_v12  ;;  %v32_v47 = vld [vmem:[%s4868_s1 + $0x88] sm:$0xff]  ;;  %v165_v48 = vld [vmem:[%s4868_s1 + $0x118] sm:$0xff]  ;;  %v166_v49 = vld [vmem:[%s4868_s1 + $0x120] sm:$0xff] }
   0xf   :  { %v173_v50 = vld [vmem:[%s4868_s1 + $0x158] sm:$0xff]  ;;  %v3641_v51 = vpack.c.bf16 %v166_v49, %v165_v48  ;;  %v174_v52 = vld [vmem:[%s4868_s1 + $0x160] sm:$0xff]  ;;  %v167_v53 = vld [vmem:[%s4868_s1 + $0x128] sm:$0xff]  ;;  %p3968_p4 = pnand %p3967_p3, %p3961_p0 }
  0x10   :  { %3215 = vmatmul.mubr.msk.f32.vlgmr.msra.gmra.mrb[0].mxu0 %vm47_vm0, %v42_v13  ;;  %v168_v54 = vld [vmem:[%s4868_s1 + $0x130] sm:$0xff]  ;;  %v3657_v55 = vpack.c.bf16 %v174_v52, %v173_v50  ;;  %v175_v57 = vld [vmem:[%s4868_s1 + $0x168] sm:$0xff]  ;;  %v169_v59 = vld [vmem:[%s4868_s1 + $0x138] sm:$0xff] }
  0x11   :  { %3217 = vmatprep.mubr.msk.f32.mxu0 %vm47_vm0, %v43_v14  ;;  %3636 = vmatpush3.bf16.msra.mxu0 %v3633_v12  ;;  %v3645_v56 = vpack.c.bf16 %v168_v54, %v167_v53  ;;  %v176_v58 = vld [vmem:[%s4868_s1 + $0x170] sm:$0xff]  ;;  %v170_v61 = vld [vmem:[%s4868_s1 + $0x140] sm:$0xff]  ;;  %v177_v62 = vld [vmem:[%s4868_s1 + $0x178] sm:$0xff] }
  0x12   :  { %3638 = vmatprep.subr.bf16.mxu0 %v3637_v20  ;;  %v3661_v60 = vpack.c.bf16 %v176_v58, %v175_v57  ;;  %v178_v63 = vld [vmem:[%s4868_s1 + $0x180] sm:$0xff]  ;;  %v3649_v0 = vpack.c.bf16 %v170_v61, %v169_v59  ;;  %v171_v3 = vld [vmem:[%s4868_s1 + $0x148] sm:$0xff]  ;;  %v172_v4 = vld [vmem:[%s4868_s1 + $0x150] sm:$0xff] }
  0x13   :  { %v3665_v1 = vpack.c.bf16 %v178_v63, %v177_v62  ;;  %v179_v5 = vld [vmem:[%s4868_s1 + $0x188] sm:$0xff]  ;;  %v3653_v7 = vpack.c.bf16 %v172_v4, %v171_v3  ;;  %v180_v8 = vld [vmem:[%s4868_s1 + $0x190] sm:$0xff]  ;;  %v39_v48 = vld [vmem:[%s4868_s1 + $0xc0] sm:$0xff] }
  0x14   :  { %3218 = vmatmul.mubr.msk.f32.gmra.mrb[2].mxu0 %vm47_vm0, %v44_v15  ;;  %v3669_v9 = vpack.c.bf16 %v180_v8, %v179_v5  ;;  %v40_v49 = vld [vmem:[%s4868_s1 + $0xc8] sm:$0xff]  ;;  %v2866_v52 = vld [vmem:[%s4869_s2 + $0x1] ss:$0 sm:$0xff] }
  0x15   :  { %3220 = vmatprep.mubr.msk.f32.mxu0 %vm47_vm0, %v45_v16  ;;  %3640 = vmatpush3.bf16.msra.mxu0 %v3637_v20  ;;  %v33_v16 = vld [vmem:[%s4868_s1 + $0x90] sm:$0xff]  ;;  %v4264_v50 = vpack.c.bf16 %v40_v49, %v39_v48 }
  0x16   :  { %3658 = vmatprep.subr.bf16.mxu0 %v3657_v55 }
  0x18   :  { %3221 = vmatmul.mubr.msk.f32.gmra.mrb[4].mxu0 %vm47_vm0, %v46_v17  ;;  %v34_v17 = vld [vmem:[%s4868_s1 + $0x98] sm:$0xff] }
  0x19   :  { %v4205_v18 = vpack.c.bf16 %v34_v17, %v33_v16 }
  0xe3   :  { %v3216_v24 = vpop.f32.mrb[0].mxu0 }
  0xe4   :  { %v4076_v25 = vadd.f32 %v3216_v24, %v22_v22  ;;  %v132_v26 = vpop.f32.mrb[1].mxu0 }
  0xe5   :  { %v4078_v27 = vadd.f32 %v132_v26, %v21_v23 }
  0xe7   :  { %v3219_v30 = vpop.f32.mrb[2].mxu0  ;;  %3252 = vmatprep.mubr.msk.f32.mxu0 %vm348_vm1, %v4078_v27  ;;  %v3621_v31 = vpack.c.bf16 %v4076_v25, %v4078_v27 }
  0xe8   :  { %v4090_v32 = vadd.f32 %v3219_v30, %v24_v28  ;;  %v142_v33 = vpop.f32.mrb[3].mxu0  ;;  %3253 = vmatmul.mubr.msk.f32.vlgmr.msra.gmra.mrb[6].mxu0 %vm348_vm1, %v4076_v25  ;;  %v35_v28 = vld [vmem:[%s4868_s1 + $0xa0] sm:$0xff] }
  0xe9   :  { %v4094_v34 = vadd.f32 %v142_v33, %v23_v29  ;;  %3622 = vmatprep.subr.bf16.mxu1 %v3621_v31  ;;  %3660 = vmatpush3.bf16.msra.mxu0 %v3657_v55  ;;  %v36_v29 = vld [vmem:[%s4868_s1 + $0xa8] sm:$0xff] }
  0xea   :  { %3624 = vmatpush3.bf16.msra.mxu1 %v3621_v31  ;;  %3662 = vmatprep.subr.bf16.mxu0 %v3661_v60 }
  0xeb   :  { %v3222_v37 = vpop.f32.mrb[4].mxu0  ;;  %3255 = vmatprep.mubr.msk.f32.mxu0 %vm348_vm1, %v4094_v34  ;;  %v3625_v38 = vpack.c.bf16 %v4090_v32, %v4094_v34 }
  0xec   :  { %v4106_v39 = vadd.f32 %v3222_v37, %v26_v35  ;;  %v152_v40 = vpop.f32.mrb[5].mxu0  ;;  %3256 = vmatmul.mubr.msk.f32.gmra.mrb[8].mxu0 %vm348_vm1, %v4090_v32  ;;  %v37_v37 = vld [vmem:[%s4868_s1 + $0xb0] sm:$0xff] }
  0xed   :  { %v4110_v41 = vadd.f32 %v152_v40, %v25_v36  ;;  %3626 = vmatprep.subr.bf16.mxu1 %v3625_v38  ;;  %3664 = vmatpush3.bf16.msra.mxu0 %v3661_v60  ;;  %v4227_v36 = vpack.c.bf16 %v36_v29, %v35_v28  ;;  %v185_v29 = vld [vmem:[%s4868_s1 + $0x1b8] sm:$0xff] }
  0xee   :  { %3628 = vmatpush3.bf16.msra.mxu1 %v3625_v38  ;;  %3666 = vmatprep.subr.bf16.mxu0 %v3665_v1  ;;  %v38_v38 = vld [vmem:[%s4868_s1 + $0xb8] sm:$0xff] }
  0xef   :  { %3258 = vmatprep.mubr.msk.f32.mxu0 %vm348_vm1, %v4110_v41  ;;  %v3629_v42 = vpack.c.bf16 %v4106_v39, %v4110_v41 }
  0xf0   :  { %3259 = vmatmul.mubr.msk.f32.gmra.mrb[10].mxu0 %vm348_vm1, %v4106_v39 }
  0xf1   :  { %3630 = vmatprep.subr.bf16.mxu1 %v3629_v42  ;;  %3668 = vmatpush3.bf16.msra.mxu0 %v3665_v1 }
  0xf2   :  { %3632 = vmatpush3.bf16.msra.mxu1 %v3629_v42  ;;  %3670 = vmatprep.subr.bf16.mxu0 %v3669_v9 }
  0xf3   :  { %3642 = vmatprep.subr.bf16.mxu1 %v3641_v51 }
  0xf5   :  { %3236 = vmatmul.mubr.msk.f32.vlgmr.msra.gmra.mrb[0].mxu1 %vm47_vm0, %v28_v43  ;;  %3672 = vmatpush3.bf16.msra.mxu0 %v3669_v9 }
  0xf6   :  { %3238 = vmatprep.mubr.msk.f32.mxu1 %vm47_vm0, %v29_v44  ;;  %3644 = vmatpush3.bf16.msra.mxu1 %v3641_v51  ;;  %v2859_v51 = vld [vmem:[%s4869_s2] ss:$0 sm:$0xff] }
  0xf7   :  { %3646 = vmatprep.subr.bf16.mxu1 %v3645_v56 }
  0xf9   :  { %3239 = vmatmul.mubr.msk.f32.gmra.mrb[2].mxu1 %vm47_vm0, %v30_v45  ;;  %v4245_v45 = vpack.c.bf16 %v38_v38, %v37_v37 }
  0xfa   :  { %3241 = vmatprep.mubr.msk.f32.mxu1 %vm47_vm0, %v31_v46  ;;  %3648 = vmatpush3.bf16.msra.mxu1 %v3645_v56 }
  0xfb   :  { %3650 = vmatprep.subr.bf16.mxu1 %v3649_v0 }
  0xfd   :  { %3242 = vmatmul.mubr.msk.f32.gmra.mrb[4].mxu1 %vm47_vm0, %v32_v47 }
  0xfe   :  { %3652 = vmatpush3.bf16.msra.mxu1 %v3649_v0 }
  0xff   :  { %3654 = vmatprep.subr.bf16.mxu1 %v3653_v7 }
 0x102   :  { %3656 = vmatpush3.bf16.msra.mxu1 %v3653_v7 }
 0x103   :  { %3674 = vmatprep.subr.bf16.mxu1 %v4205_v18 }
 0x1bb   :  { %v4174_v2 = vpop.f32.mrb[6].mxu0 }
 0x1bc   :  { %v4185_v6 = vpop.f32.mrb[7].mxu0  ;;  %v449_v55 = vadd.f32 %v4174_v2, %v2859_v51 }
 0x1bd   :  { %v444_v59 = vadd.f32 %v2859_v51, %v4185_v6 }
 0x1bf   :  { %v4190_v10 = vpop.f32.mrb[8].mxu0 }
 0x1c0   :  { %v4192_v11 = vpop.f32.mrb[9].mxu0  ;;  %v459_v1 = vadd.f32 %v4190_v10, %v2859_v51 }
 0x1c1   :  { %v454_v2 = vadd.f32 %v2859_v51, %v4192_v11 }
 0x1c3   :  { %v4194_v12 = vpop.f32.mrb[10].mxu0 }
 0x1c4   :  { %v4196_v13 = vpop.f32.mrb[11].mxu0 }
 0x1c8   :  { %v3237_v14 = vpop.f32.mrb[0].mxu1 }
 0x1c9   :  { %v295_v15 = vpop.f32.mrb[1].mxu1 }
 0x1ca   :  { %330 = vrot.lane.b32.xlu0 %v295_v15, %s3984_s17  ;;  %v469_v15 = vadd.f32 %v4194_v12, %v2859_v51  ;;  %v181_v12 = vld [vmem:[%s4868_s1 + $0x198] sm:$0xff] }
 0x1cc   :  { %v3240_v19 = vpop.f32.mrb[2].mxu1 }
 0x1cd   :  { %v305_v20 = vpop.f32.mrb[3].mxu1 }
 0x1ce   :  { %332 = vrot.lane.b32.xlu0 %v3237_v14, %s3984_s17  ;;  %334 = vrot.lane.b32.xlu1 %v305_v20, %s3984_s17 }
 0x1d0   :  { %v3243_v22 = vpop.f32.mrb[4].mxu1 }
 0x1d1   :  { %v315_v23 = vpop.f32.mrb[5].mxu1 }
 0x1d2   :  { %336 = vrot.lane.b32.xlu1 %v3240_v19, %s3984_s17  ;;  %338 = vrot.lane.b32.xlu0 %v315_v23, %s3984_s17  ;;  %v464_v19 = vadd.f32 %v2859_v51, %v4196_v13  ;;  %v182_v23 = vld [vmem:[%s4868_s1 + $0x1a0] sm:$0xff] }
 0x1d3   :  { %v3689_v13 = vpack.c.bf16 %v182_v23, %v181_v12 }
 0x1d5   :  { %3690 = vmatprep.subr.bf16.mxu0 %v3689_v13 }
 0x1d6   :  { %340 = vrot.lane.b32.xlu1 %v3243_v22, %s3984_s17 }
 0x23c   :  { %v331_v24 = vpop.permute.xlu0 %330 }
 0x23d   :  { %v349_v26 = vsel %vm348_vm1, %v4078_v27, %v331_v24  ;;  %v183_v24 = vld [vmem:[%s4868_s1 + $0x1a8] sm:$0xff] }
 0x23e   :  { %3277 = vmatprep.mubr.msk.f32.mxu1 %vm476_vm2, %v349_v26  ;;  %3302 = vmatprep.mubr.msk.f32.mxu0 %vm476_vm2, %v349_v26  ;;  %v184_v26 = vld [vmem:[%s4868_s1 + $0x1b0] sm:$0xff] }
 0x23f   :  { %v3693_v28 = vpack.c.bf16 %v184_v26, %v183_v24 }
 0x240   :  { %v333_v30 = vpop.permute.xlu0 %332  ;;  %v335_v31 = vpop.permute.xlu1 %334 }
 0x241   :  { %v350_v33 = vsel %vm348_vm1, %v4076_v25, %v333_v30  ;;  %v351_v35 = vsel %vm348_vm1, %v4094_v34, %v335_v31  ;;  %v186_v30 = vld [vmem:[%s4868_s1 + $0x1c0] sm:$0xff] }
 0x242   :  { %3278 = vmatmul.mubr.msk.f32.vlgmr.msra.gmra.mrb[6].mxu1 %vm476_vm2, %v350_v33  ;;  %3303 = vmatmul.mubr.msk.f32.vlgmr.msra.gmra.mrb[12].mxu0 %vm476_vm2, %v350_v33  ;;  %v3697_v31 = vpack.c.bf16 %v186_v30, %v185_v29  ;;  %v187_v33 = vld [vmem:[%s4868_s1 + $0x1c8] sm:$0xff] }
 0x243   :  { %3280 = vmatprep.mubr.msk.f32.mxu1 %vm476_vm2, %v351_v35  ;;  %3305 = vmatprep.mubr.msk.f32.mxu0 %vm476_vm2, %v351_v35  ;;  %v188_v35 = vld [vmem:[%s4868_s1 + $0x1d0] sm:$0xff] }
 0x244   :  { %v337_v40 = vpop.permute.xlu1 %336  ;;  %v339_v42 = vpop.permute.xlu0 %338  ;;  %3676 = vmatpush3.bf16.msra.mxu1 %v4205_v18  ;;  %3692 = vmatpush3.bf16.msra.mxu0 %v3689_v13  ;;  %v3701_v37 = vpack.c.bf16 %v188_v35, %v187_v33 }
 0x245   :  { %v352_v43 = vsel %vm348_vm1, %v4090_v32, %v337_v40  ;;  %v353_v44 = vsel %vm348_vm1, %v4110_v41, %v339_v42  ;;  %3678 = vmatprep.subr.bf16.mxu1 %v4227_v36  ;;  %3694 = vmatprep.subr.bf16.mxu0 %v3693_v28 }
 0x246   :  { %3281 = vmatmul.mubr.msk.f32.gmra.mrb[8].mxu1 %vm476_vm2, %v352_v43  ;;  %3306 = vmatmul.mubr.msk.f32.gmra.mrb[14].mxu0 %vm476_vm2, %v352_v43 }
 0x247   :  { %3283 = vmatprep.mubr.msk.f32.mxu1 %vm476_vm2, %v353_v44  ;;  %3308 = vmatprep.mubr.msk.f32.mxu0 %vm476_vm2, %v353_v44 }
 0x248   :  { %v341_v46 = vpop.permute.xlu1 %340  ;;  %3680 = vmatpush3.bf16.msra.mxu1 %v4227_v36  ;;  %3696 = vmatpush3.bf16.msra.mxu0 %v3693_v28  ;;  %v2892_v28 = vld [vmem:[%s4869_s2 + $0x3] ss:$0 sm:$0xff] }
 0x249   :  { %v354_v47 = vsel %vm348_vm1, %v4106_v39, %v341_v46  ;;  %3682 = vmatprep.subr.bf16.mxu1 %v4245_v45  ;;  %3698 = vmatprep.subr.bf16.mxu0 %v3697_v31 }
 0x24a   :  { %3284 = vmatmul.mubr.msk.f32.gmra.mrb[10].mxu1 %vm476_vm2, %v354_v47  ;;  %3309 = vmatmul.mubr.msk.f32.gmra.mrb[16].mxu0 %vm476_vm2, %v354_v47 }
 0x24c   :  { %3684 = vmatpush3.bf16.msra.mxu1 %v4245_v45  ;;  %3700 = vmatpush3.bf16.msra.mxu0 %v3697_v31 }
 0x24d   :  { %3686 = vmatprep.subr.bf16.mxu1 %v4264_v50  ;;  %3702 = vmatprep.subr.bf16.mxu0 %v3701_v37 }
 0x250   :  { %3688 = vmatpush3.bf16.msra.mxu1 %v4264_v50  ;;  %3704 = vmatpush3.bf16.msra.mxu0 %v3701_v37 }
 0x315   :  { %v3279_v53 = vpop.f32.mrb[6].mxu1  ;;  %v4274_v54 = vpop.f32.mrb[12].mxu0 }
 0x316   :  { %v567_v56 = vadd.f32 %v3279_v53, %v2866_v52  ;;  %v561_v57 = vpop.f32.mrb[7].mxu1  ;;  %v4277_v58 = vpop.f32.mrb[13].mxu0 }
 0x317   :  { %v562_v60 = vadd.f32 %v2866_v52, %v561_v57 }
 0x318   :  { %v690_v61 = vmul.f32 %v567_v56, %v449_v55 }
 0x319   :  { %v689_v62 = vmul.f32 %v562_v60, %v444_v59  ;;  %v3282_v63 = vpop.f32.mrb[8].mxu1  ;;  %v4280_v0 = vpop.f32.mrb[14].mxu0 }
 0x31a   :  { %v577_v3 = vadd.f32 %v3282_v63, %v2866_v52  ;;  %v571_v4 = vpop.f32.mrb[9].mxu1  ;;  %v4283_v5 = vpop.f32.mrb[15].mxu0 }
 0x31b   :  { %v572_v7 = vadd.f32 %v2866_v52, %v571_v4  ;;  %3327 = vmatprep.mubr.msk.f32.mxu1 %vm476_vm2, %v689_v62  ;;  %v2873_v4 = vld [vmem:[%s4869_s2 + $0x2] ss:$0 sm:$0xff] }
 0x31c   :  { %v692_v8 = vmul.f32 %v577_v3, %v459_v1  ;;  %3328 = vmatmul.mubr.msk.f32.vlgmr.msra.gmra.mrb[12].mxu1 %vm476_vm2, %v690_v61 }
 0x31d   :  { %v691_v6 = vmul.f32 %v572_v7, %v454_v2  ;;  %v3285_v9 = vpop.f32.mrb[10].mxu1  ;;  %v4288_v14 = vpop.f32.mrb[16].mxu0 }
 0x31e   :  { %v587_v16 = vadd.f32 %v3285_v9, %v2866_v52  ;;  %v581_v10 = vpop.f32.mrb[11].mxu1  ;;  %v4291_v17 = vpop.f32.mrb[17].mxu0  ;;  %v661_v9 = vadd.f32 %v2873_v4, %v4277_v58 }
 0x31f   :  { %v582_v20 = vadd.f32 %v2866_v52, %v581_v10  ;;  %3330 = vmatprep.mubr.msk.f32.mxu1 %vm476_vm2, %v691_v6  ;;  %v681_v58 = vadd.f32 %v2873_v4, %v4291_v17 }
 0x320   :  { %v694_v11 = vmul.f32 %v587_v16, %v469_v15  ;;  %3331 = vmatmul.mubr.msk.f32.gmra.mrb[14].mxu1 %vm476_vm2, %v692_v8  ;;  %v666_v8 = vadd.f32 %v4274_v54, %v2873_v4  ;;  %v686_v54 = vadd.f32 %v4288_v14, %v2873_v4 }
 0x321   :  { %v693_v22 = vmul.f32 %v582_v20, %v464_v19  ;;  %v676_v19 = vadd.f32 %v4280_v0, %v2873_v4 }
 0x323   :  { %3333 = vmatprep.mubr.msk.f32.mxu1 %vm476_vm2, %v693_v22 }
 0x324   :  { %3334 = vmatmul.mubr.msk.f32.gmra.mrb[16].mxu1 %vm476_vm2, %v694_v11  ;;  %v671_v11 = vadd.f32 %v2873_v4, %v4283_v5 }
 0x3ef   :  { %v3329_v38 = vpop.f32.mrb[12].mxu1 }
 0x3f0   :  { %v810_v40 = vmul.f32 1.442695, %v3329_v38  ;;  %v779_v42 = vpop.f32.mrb[13].mxu1 }
 0x3f1   :  { %v808_v43 = vmul.f32 1.442695, %v779_v42 }
 0x3f2   :  { %3857 = vpow2.f32 %v810_v40 }
 0x3f3   :  { %3859 = vpow2.f32 %v808_v43  ;;  %v3332_v44 = vpop.f32.mrb[14].mxu1 }
 0x3f4   :  { %v814_v46 = vmul.f32 1.442695, %v3332_v44  ;;  %v789_v47 = vpop.f32.mrb[15].mxu1 }
 0x3f5   :  { %v812_v48 = vmul.f32 1.442695, %v789_v47 }
 0x3f6   :  { %3861 = vpow2.f32 %v814_v46 }
 0x3f7   :  { %3863 = vpow2.f32 %v812_v48  ;;  %v3335_v49 = vpop.f32.mrb[16].mxu1 }
 0x3f8   :  { %v818_v51 = vmul.f32 1.442695, %v3335_v49  ;;  %v799_v52 = vpop.f32.mrb[17].mxu1 }
 0x3f9   :  { %v816_v53 = vmul.f32 1.442695, %v799_v52 }
 0x3fa   :  { %3865 = vpow2.f32 %v818_v51 }
 0x3fb   :  { %3867 = vpow2.f32 %v816_v53 }
 0x3fc   :  { %v3858_v55 = vpop.eup %3857 }
 0x3fd   :  { %v3860_v56 = vpop.eup %3859  ;;  %v821_v57 = vadd.f32 1.0, %v3858_v55 }
 0x3fe   :  { %v820_v59 = vadd.f32 1.0, %v3860_v56 }
 0x3ff   :  { %3869 = vrcp.f32 %v821_v57 }
 0x400   :  { %v3862_v60 = vpop.eup %3861  ;;  %3871 = vrcp.f32 %v820_v59 }
 0x401   :  { %v3864_v61 = vpop.eup %3863  ;;  %v823_v62 = vadd.f32 1.0, %v3862_v60 }
 0x402   :  { %v822_v63 = vadd.f32 1.0, %v3864_v61 }
 0x403   :  { %3873 = vrcp.f32 %v823_v62 }
 0x404   :  { %v3866_v1 = vpop.eup %3865  ;;  %3875 = vrcp.f32 %v822_v63 }
 0x405   :  { %v3868_v3 = vpop.eup %3867  ;;  %v825_v2 = vadd.f32 1.0, %v3866_v1 }
 0x406   :  { %v824_v7 = vadd.f32 1.0, %v3868_v3 }
 0x407   :  { %3877 = vrcp.f32 %v825_v2 }
 0x408   :  { %3879 = vrcp.f32 %v824_v7 }
 0x409   :  { %v3870_v6 = vpop.eup %3869 }
 0x40a   :  { %v3872_v15 = vpop.eup %3871  ;;  %v833_v16 = vmul.f32 %v3870_v6, %v666_v8 }
 0x40b   :  { %v832_v10 = vmul.f32 %v3872_v15, %v661_v9 }
 0x40d   :  { %v3874_v20 = vpop.eup %3873  ;;  %3352 = vmatprep.mubr.msk.f32.mxu0 %vm476_vm2, %v832_v10 }
 0x40e   :  { %v3876_v22 = vpop.eup %3875  ;;  %3353 = vmatmul.mubr.msk.f32.vlgmr.msra.gmra.mrb[18].mxu0 %vm476_vm2, %v833_v16  ;;  %v835_v12 = vmul.f32 %v3874_v20, %v676_v19 }
 0x40f   :  { %v834_v23 = vmul.f32 %v3876_v22, %v671_v11 }
 0x411   :  { %v3878_v13 = vpop.eup %3877  ;;  %3355 = vmatprep.mubr.msk.f32.mxu0 %vm476_vm2, %v834_v23 }
 0x412   :  { %v3880_v24 = vpop.eup %3879  ;;  %3356 = vmatmul.mubr.msk.f32.gmra.mrb[20].mxu0 %vm476_vm2, %v835_v12  ;;  %v837_v0 = vmul.f32 %v3878_v13, %v686_v54 }
 0x413   :  { %v836_v26 = vmul.f32 %v3880_v24, %v681_v58  ;;  %v189_v58 = vld [vmem:[%s4868_s1 + $0x1d8] sm:$0xff]  ;;  %v190_v24 = vld [vmem:[%s4868_s1 + $0x1e0] sm:$0xff] }
 0x415   :  { %3358 = vmatprep.mubr.msk.f32.mxu0 %vm476_vm2, %v836_v26  ;;  %v191_v26 = vld [vmem:[%s4868_s1 + $0x1e8] sm:$0xff] }
 0x416   :  { %3359 = vmatmul.mubr.msk.f32.gmra.mrb[22].mxu0 %vm476_vm2, %v837_v0  ;;  %v3705_v0 = vpack.c.bf16 %v190_v24, %v189_v58 }
 0x418   :  { %3706 = vmatprep.subr.bf16.mxu1 %v3705_v0 }
 0x419   :  { %3708 = vmatpush3.bf16.msra.mxu1 %v3705_v0 }
 0x4e1   :  { %v3354_v5 = vpop.f32.mrb[18].mxu0 }
 0x4e2   :  { %v952_v14 = vadd.f32 %v3354_v5, %v4076_v25  ;;  %v922_v29 = vpop.f32.mrb[19].mxu0  ;;  %v192_v5 = vld [vmem:[%s4868_s1 + $0x1f0] sm:$0xff] }
 0x4e3   :  { %v951_v17 = vadd.f32 %v922_v29, %v4078_v27  ;;  %v194_v29 = vld [vmem:[%s4868_s1 + $0x200] sm:$0xff] }
 0x4e4   :  { %v962_v30 = vadd.f32 %v2892_v28, %v952_v14  ;;  %v193_v14 = vld [vmem:[%s4868_s1 + $0x1f8] sm:$0xff] }
 0x4e5   :  { %v3357_v31 = vpop.f32.mrb[20].mxu0  ;;  %v961_v33 = vadd.f32 %v2892_v28, %v951_v17  ;;  %v195_v17 = vld [vmem:[%s4868_s1 + $0x208] sm:$0xff] }
 0x4e6   :  { %v932_v35 = vpop.f32.mrb[21].mxu0  ;;  %v970_v37 = vsel %vm348_vm1, %v962_v30, 0.0  ;;  %v954_v38 = vadd.f32 %v3357_v31, %v4090_v32  ;;  %v196_v31 = vld [vmem:[%s4868_s1 + $0x210] sm:$0xff] }
 0x4e7   :  { %v953_v40 = vadd.f32 %v932_v35, %v4094_v34  ;;  %971 = vadd.xlane.f32.xlu1 %v970_v37  ;;  %v967_v42 = vsel %vm348_vm1, %v961_v33, 0.0  ;;  %v197_v35 = vld [vmem:[%s4868_s1 + $0x218] sm:$0xff]  ;;  %v198_v37 = vld [vmem:[%s4868_s1 + $0x220] sm:$0xff] }
 0x4e8   :  { %968 = vadd.xlane.f32.xlu0 %v967_v42  ;;  %v964_v48 = vadd.f32 %v2892_v28, %v954_v38  ;;  %v3721_v38 = vpack.c.bf16 %v198_v37, %v197_v35 }
 0x4e9   :  { %v3360_v43 = vpop.f32.mrb[22].mxu0  ;;  %v963_v44 = vadd.f32 %v2892_v28, %v953_v40 }
 0x4ea   :  { %v942_v25 = vpop.f32.mrb[23].mxu0  ;;  %v956_v46 = vadd.f32 %v3360_v43, %v4106_v39  ;;  %v976_v32 = vsel %vm348_vm1, %v964_v48, 0.0 }
 0x4eb   :  { %v955_v27 = vadd.f32 %v942_v25, %v4110_v41  ;;  %v973_v47 = vsel %vm348_vm1, %v963_v44, 0.0 }
 0x4ec   :  { %974 = vadd.xlane.f32.xlu0 %v973_v47  ;;  %v966_v51 = vadd.f32 %v2892_v28, %v956_v46 }
 0x4ed   :  { %v965_v49 = vadd.f32 %v2892_v28, %v955_v27  ;;  %v3709_v28 = vpack.c.bf16 %v192_v5, %v191_v26  ;;  %v2895_v26 = vld [vmem:[%s4869_s2 + $0x4] ss:$0 sm:$0xff] }
 0x4ee   :  { %v982_v52 = vsel %vm348_vm1, %v966_v51, 0.0 }
 0x4ef   :  { %v979_v34 = vsel %vm348_vm1, %v965_v49, 0.0  ;;  %3710 = vmatprep.subr.bf16.mxu1 %v3709_v28 }
 0x4f0   :  { %977 = vadd.xlane.f32.xlu0 %v976_v32  ;;  %980 = vadd.xlane.f32.xlu1 %v979_v34 }
 0x4f1   :  { %3712 = vmatpush3.bf16.msra.mxu1 %v3709_v28 }
 0x4f4   :  { %983 = vadd.xlane.f32.xlu0 %v982_v52 }
 0x574   :  { %v972_v53 = vpop.xlane.xlu1 %971 }
 0x575   :  { %v987_v55 = vmul.f32 0.03125, %v972_v53  ;;  %v969_v39 = vpop.xlane.xlu0 %968 }
 0x576   :  { %v986_v56 = vmul.f32 0.03125, %v969_v39 }
 0x577   :  { %v4352_v41 = vsub.f32 %v962_v30, %v987_v55  ;;  %v3713_v30 = vpack.c.bf16 %v194_v29, %v193_v14 }
 0x578   :  { %v4354_v57 = vsub.f32 %v961_v33, %v986_v56  ;;  %v3717_v33 = vpack.c.bf16 %v196_v31, %v195_v17 }
 0x579   :  { %v975_v59 = vpop.xlane.xlu0 %974  ;;  %v999_v60 = vmul.f32 %v4352_v41, %v4352_v41  ;;  %3714 = vmatprep.subr.bf16.mxu0 %v3713_v30 }
 0x57a   :  { %v988_v61 = vmul.f32 0.03125, %v975_v59  ;;  %v998_v62 = vmul.f32 %v4354_v57, %v4354_v57  ;;  %3716 = vmatpush3.bf16.msra.mxu0 %v3713_v30  ;;  %v2893_v59 = vld [vmem:[%s4869_s2 + $0x6] ss:$0 sm:$0xff] }
 0x57b   :  { %v1007_v63 = vsel %vm348_vm1, %v999_v60, 0.0  ;;  %3718 = vmatprep.subr.bf16.mxu0 %v3717_v33 }
 0x57c   :  { %v4361_v1 = vsub.f32 %v963_v44, %v988_v61  ;;  %1008 = vadd.xlane.f32.xlu0 %v1007_v63  ;;  %v1004_v3 = vsel %vm348_vm1, %v998_v62, 0.0 }
 0x57d   :  { %v978_v4 = vpop.xlane.xlu0 %977  ;;  %1005 = vadd.xlane.f32.xlu1 %v1004_v3  ;;  %v981_v2 = vpop.xlane.xlu1 %980  ;;  %v2894_v3 = vld [vmem:[%s4869_s2 + $0x7] ss:$0 sm:$0xff] }
 0x57e   :  { %v989_v7 = vmul.f32 0.03125, %v978_v4  ;;  %v990_v8 = vmul.f32 0.03125, %v981_v2  ;;  %v1000_v6 = vmul.f32 %v4361_v1, %v4361_v1  ;;  %3720 = vmatpush3.bf16.msra.mxu0 %v3717_v33 }
 0x57f   :  { %3722 = vmatprep.subr.bf16.mxu0 %v3721_v38 }
 0x580   :  { %v4366_v9 = vsub.f32 %v964_v48, %v989_v7  ;;  %v4368_v15 = vsub.f32 %v965_v49, %v990_v8  ;;  %v1010_v16 = vsel %vm348_vm1, %v1000_v6, 0.0 }
 0x581   :  { %v984_v10 = vpop.xlane.xlu0 %983  ;;  %1011 = vadd.xlane.f32.xlu1 %v1010_v16 }
 0x582   :  { %v991_v19 = vmul.f32 0.03125, %v984_v10  ;;  %v1001_v20 = vmul.f32 %v4366_v9, %v4366_v9  ;;  %v1002_v11 = vmul.f32 %v4368_v15, %v4368_v15  ;;  %3724 = vmatpush3.bf16.msra.mxu0 %v3721_v38 }
 0x584   :  { %v4375_v22 = vsub.f32 %v966_v51, %v991_v19  ;;  %v1013_v12 = vsel %vm348_vm1, %v1001_v20, 0.0  ;;  %v1016_v23 = vsel %vm348_vm1, %v1002_v11, 0.0 }
 0x585   :  { %1014 = vadd.xlane.f32.xlu0 %v1013_v12  ;;  %1017 = vadd.xlane.f32.xlu1 %v1016_v23 }
 0x586   :  { %v1003_v54 = vmul.f32 %v4375_v22, %v4375_v22 }
 0x588   :  { %v1019_v13 = vsel %vm348_vm1, %v1003_v54, 0.0 }
 0x589   :  { %1020 = vadd.xlane.f32.xlu0 %v1019_v13 }
 0x609   :  { %v1009_v40 = vpop.xlane.xlu0 %1008 }
 0x60a   :  { %v1023_v42 = vmul.f32 0.03125, %v1009_v40  ;;  %v1006_v43 = vpop.xlane.xlu1 %1005 }
 0x60b   :  { %v1022_v44 = vmul.f32 0.03125, %v1006_v43 }
 0x60c   :  { %v1029_v25 = vadd.f32 1e-05, %v1023_v42 }
 0x60d   :  { %v1028_v46 = vadd.f32 1e-05, %v1022_v44 }
 0x60e   :  { %3881 = vrsqrt.f32 %v1029_v25  ;;  %v1012_v27 = vpop.xlane.xlu1 %1011 }
 0x60f   :  { %3883 = vrsqrt.f32 %v1028_v46  ;;  %v1024_v47 = vmul.f32 0.03125, %v1012_v27 }
 0x611   :  { %v1030_v48 = vadd.f32 1e-05, %v1024_v47  ;;  %v2908_v47 = vld [vmem:[%s4869_s2 + $0x5] ss:$0 sm:$0xff] }
 0x612   :  { %v1015_v49 = vpop.xlane.xlu0 %1014  ;;  %v1018_v32 = vpop.xlane.xlu1 %1017 }
 0x613   :  { %3885 = vrsqrt.f32 %v1030_v48  ;;  %v1025_v34 = vmul.f32 0.03125, %v1015_v49  ;;  %v1026_v51 = vmul.f32 0.03125, %v1018_v32 }
 0x615   :  { %v1031_v52 = vadd.f32 1e-05, %v1025_v34  ;;  %v1032_v53 = vadd.f32 1e-05, %v1026_v51 }
 0x616   :  { %v1021_v55 = vpop.xlane.xlu0 %1020 }
 0x617   :  { %3887 = vrsqrt.f32 %v1031_v52  ;;  %v1027_v39 = vmul.f32 0.03125, %v1021_v55 }
 0x618   :  { %v3882_v56 = vpop.eup %3881  ;;  %3889 = vrsqrt.f32 %v1032_v53 }
 0x619   :  { %v3884_v60 = vpop.eup %3883  ;;  %v1041_v61 = vmul.f32 %v3882_v56, %v4352_v41  ;;  %v1033_v62 = vadd.f32 1e-05, %v1027_v39 }
 0x61a   :  { %v1040_v63 = vmul.f32 %v3884_v60, %v4354_v57 }
 0x61b   :  { %v1051_v4 = vmul.f32 %v2893_v59, %v1041_v61  ;;  %3891 = vrsqrt.f32 %v1033_v62 }
 0x61c   :  { %v1050_v2 = vmul.f32 %v2893_v59, %v1040_v63 }
 0x61d   :  { %v3886_v7 = vpop.eup %3885  ;;  %v1061_v16 = vadd.f32 %v2894_v3, %v1051_v4 }
 0x61e   :  { %v1060_v8 = vadd.f32 %v2894_v3, %v1050_v2  ;;  %v1042_v6 = vmul.f32 %v3886_v7, %v4361_v1 }
 0x620   :  { %3369 = vmatprep.mubr.msk.f32.mxu1 %vm348_vm1, %v1060_v8  ;;  %v1052_v10 = vmul.f32 %v2893_v59, %v1042_v6 }
 0x621   :  { %v3888_v19 = vpop.eup %3887  ;;  %3370 = vmatmul.mubr.msk.f32.vlgmr.msra.gmra.mrb[18].mxu1 %vm348_vm1, %v1061_v16 }
 0x622   :  { %v3890_v41 = vpop.eup %3889  ;;  %v1062_v57 = vadd.f32 %v2894_v3, %v1052_v10  ;;  %v1043_v20 = vmul.f32 %v3888_v19, %v4366_v9  ;;  %v199_v9 = vld [vmem:[%s4868_s1 + $0x228] sm:$0xff] }
 0x623   :  { %v1044_v11 = vmul.f32 %v3890_v41, %v4368_v15  ;;  %v200_v15 = vld [vmem:[%s4868_s1 + $0x230] sm:$0xff] }
 0x624   :  { %3372 = vmatprep.mubr.msk.f32.mxu1 %vm348_vm1, %v1062_v57  ;;  %v1053_v12 = vmul.f32 %v2893_v59, %v1043_v20 }
 0x625   :  { %v3892_v23 = vpop.eup %3891  ;;  %v1054_v54 = vmul.f32 %v2893_v59, %v1044_v11 }
 0x626   :  { %v1063_v13 = vadd.f32 %v2894_v3, %v1053_v12  ;;  %v1045_v1 = vmul.f32 %v3892_v23, %v4375_v22  ;;  %v3725_v22 = vpack.c.bf16 %v200_v15, %v199_v9 }
 0x627   :  { %v1064_v58 = vadd.f32 %v2894_v3, %v1054_v54 }
 0x628   :  { %3373 = vmatmul.mubr.msk.f32.gmra.mrb[20].mxu1 %vm348_vm1, %v1063_v13  ;;  %v1055_v24 = vmul.f32 %v2893_v59, %v1045_v1  ;;  %3726 = vmatprep.subr.bf16.mxu0 %v3725_v22 }
 0x629   :  { %3375 = vmatprep.mubr.msk.f32.mxu1 %vm348_vm1, %v1064_v58  ;;  %3728 = vmatpush3.bf16.msra.mxu0 %v3725_v22 }
 0x62a   :  { %v1065_v0 = vadd.f32 %v2894_v3, %v1055_v24 }
 0x62c   :  { %3376 = vmatmul.mubr.msk.f32.gmra.mrb[22].mxu1 %vm348_vm1, %v1065_v0 }
 0x62d   :  { %3415 = vmatprep.mubr.msk.f32.mxu1 %vm47_vm0, %v4066_v21 }
 0x6f4   :  { %v3371_v5 = vpop.f32.mrb[18].mxu1 }
 0x6f5   :  { %v1160_v28 = vadd.f32 %v3371_v5, %v2895_v26  ;;  %v1154_v14 = vpop.f32.mrb[19].mxu1 }
 0x6f6   :  { %v1155_v29 = vadd.f32 %v2895_v26, %v1154_v14 }
 0x6f7   :  { %v1184_v17 = vmax.f32 %v1160_v28, 0.0 }
 0x6f8   :  { %v1183_v21 = vmax.f32 %v1155_v29, 0.0 }
 0x6fa   :  { %3394 = vmatprep.mubr.msk.f32.mxu0 %vm476_vm2, %v1183_v21 }
 0x6fb   :  { %v3374_v30 = vpop.f32.mrb[20].mxu1  ;;  %3395 = vmatmul.mubr.msk.f32.vlgmr.msra.gmra.mrb[24].mxu0 %vm476_vm2, %v1184_v17 }
 0x6fc   :  { %v1170_v31 = vadd.f32 %v3374_v30, %v2895_v26  ;;  %v1164_v33 = vpop.f32.mrb[21].mxu1 }
 0x6fd   :  { %v1165_v35 = vadd.f32 %v2895_v26, %v1164_v33 }
 0x6fe   :  { %v1186_v40 = vmax.f32 %v1170_v31, 0.0 }
 0x6ff   :  { %v1185_v37 = vmax.f32 %v1165_v35, 0.0  ;;  %v3377_v38 = vpop.f32.mrb[22].mxu1 }
 0x700   :  { %v1180_v42 = vadd.f32 %v3377_v38, %v2895_v26  ;;  %v1174_v43 = vpop.f32.mrb[23].mxu1 }
 0x701   :  { %v1175_v44 = vadd.f32 %v2895_v26, %v1174_v43  ;;  %3397 = vmatprep.mubr.msk.f32.mxu0 %vm476_vm2, %v1185_v37 }
 0x702   :  { %3398 = vmatmul.mubr.msk.f32.gmra.mrb[26].mxu0 %vm476_vm2, %v1186_v40  ;;  %v1188_v46 = vmax.f32 %v1180_v42, 0.0 }
 0x703   :  { %v1187_v25 = vmax.f32 %v1175_v44, 0.0 }
 0x705   :  { %3400 = vmatprep.mubr.msk.f32.mxu0 %vm476_vm2, %v1187_v25 }
 0x706   :  { %3401 = vmatmul.mubr.msk.f32.gmra.mrb[28].mxu0 %vm476_vm2, %v1188_v46 }
 0x7ce   :  { %v3396_v27 = vpop.f32.mrb[24].mxu0 }
 0x7cf   :  { %v1303_v48 = vadd.f32 %v3396_v27, %v1061_v16  ;;  %v1273_v49 = vpop.f32.mrb[25].mxu0 }
 0x7d0   :  { %v1302_v32 = vadd.f32 %v1273_v49, %v1060_v8 }
 0x7d1   :  { %v1313_v34 = vadd.f32 %v2908_v47, %v1303_v48 }
 0x7d2   :  { %v1312_v51 = vadd.f32 %v2908_v47, %v1302_v32 }
 0x7d3   :  { %v1321_v52 = vsel %vm348_vm1, %v1313_v34, 0.0 }
 0x7d4   :  { %1322 = vadd.xlane.f32.xlu0 %v1321_v52  ;;  %v1318_v53 = vsel %vm348_vm1, %v1312_v51, 0.0 }
 0x7d5   :  { %1319 = vadd.xlane.f32.xlu1 %v1318_v53  ;;  %v3399_v55 = vpop.f32.mrb[26].mxu0 }
 0x7d6   :  { %v1305_v39 = vadd.f32 %v3399_v55, %v1063_v13  ;;  %v1283_v56 = vpop.f32.mrb[27].mxu0 }
 0x7d7   :  { %v1304_v59 = vadd.f32 %v1283_v56, %v1062_v57 }
 0x7d8   :  { %v1315_v60 = vadd.f32 %v2908_v47, %v1305_v39 }
 0x7d9   :  { %v3402_v61 = vpop.f32.mrb[28].mxu0  ;;  %v1314_v62 = vadd.f32 %v2908_v47, %v1304_v59 }
 0x7da   :  { %v1307_v63 = vadd.f32 %v3402_v61, %v1065_v0  ;;  %v1293_v3 = vpop.f32.mrb[29].mxu0  ;;  %v1327_v4 = vsel %vm348_vm1, %v1315_v60, 0.0  ;;  %v2909_v61 = vld [vmem:[%s4869_s2 + $0x8] ss:$0 sm:$0xff] }
 0x7db   :  { %v1306_v2 = vadd.f32 %v1293_v3, %v1064_v58  ;;  %1328 = vadd.xlane.f32.xlu0 %v1327_v4  ;;  %v1324_v7 = vsel %vm348_vm1, %v1314_v62, 0.0  ;;  %v2910_v4 = vld [vmem:[%s4869_s2 + $0x9] ss:$0 sm:$0xff] }
 0x7dc   :  { %1325 = vadd.xlane.f32.xlu1 %v1324_v7  ;;  %v1317_v8 = vadd.f32 %v2908_v47, %v1307_v63 }
 0x7dd   :  { %v1316_v6 = vadd.f32 %v2908_v47, %v1306_v2 }
 0x7de   :  { %v1333_v16 = vsel %vm348_vm1, %v1317_v8, 0.0 }
 0x7df   :  { %1334 = vadd.xlane.f32.xlu0 %v1333_v16  ;;  %v1330_v10 = vsel %vm348_vm1, %v1316_v6, 0.0 }
 0x7e0   :  { %1331 = vadd.xlane.f32.xlu1 %v1330_v10 }
 0x861   :  { %v1323_v19 = vpop.xlane.xlu0 %1322 }
 0x862   :  { %v1337_v41 = vmul.f32 0.03125, %v1323_v19  ;;  %v1320_v57 = vpop.xlane.xlu1 %1319 }
 0x863   :  { %v1336_v20 = vmul.f32 0.03125, %v1320_v57 }
 0x864   :  { %v1343_v11 = vsub.f32 %v1313_v34, %v1337_v41 }
 0x865   :  { %v1342_v12 = vsub.f32 %v1312_v51, %v1336_v20 }
 0x866   :  { %v1349_v23 = vmul.f32 %v1343_v11, %v1343_v11 }
 0x867   :  { %v1348_v54 = vmul.f32 %v1342_v12, %v1342_v12 }
 0x868   :  { %v1329_v13 = vpop.xlane.xlu0 %1328  ;;  %v1357_v1 = vsel %vm348_vm1, %v1349_v23, 0.0 }
 0x869   :  { %v1339_v58 = vmul.f32 0.03125, %v1329_v13  ;;  %1358 = vadd.xlane.f32.xlu0 %v1357_v1  ;;  %v1326_v24 = vpop.xlane.xlu1 %1325  ;;  %v1354_v0 = vsel %vm348_vm1, %v1348_v54, 0.0 }
 0x86a   :  { %v1338_v9 = vmul.f32 0.03125, %v1326_v24  ;;  %1355 = vadd.xlane.f32.xlu1 %v1354_v0 }
 0x86b   :  { %v1345_v15 = vsub.f32 %v1315_v60, %v1339_v58 }
 0x86c   :  { %v1344_v22 = vsub.f32 %v1314_v62, %v1338_v9  ;;  %v1335_v26 = vpop.xlane.xlu0 %1334 }
 0x86d   :  { %v1341_v5 = vmul.f32 0.03125, %v1335_v26  ;;  %v1332_v28 = vpop.xlane.xlu1 %1331  ;;  %v1351_v14 = vmul.f32 %v1345_v15, %v1345_v15  ;;  %v1417_v26 = vld [vmem:[%s4868_s1 + $0x240] sm:$0xff] }
 0x86e   :  { %v1340_v29 = vmul.f32 0.03125, %v1332_v28  ;;  %v1350_v21 = vmul.f32 %v1344_v22, %v1344_v22 }
 0x86f   :  { %v1347_v17 = vsub.f32 %v1317_v8, %v1341_v5  ;;  %v1363_v30 = vsel %vm348_vm1, %v1351_v14, 0.0 }
 0x870   :  { %v1346_v31 = vsub.f32 %v1316_v6, %v1340_v29  ;;  %1364 = vadd.xlane.f32.xlu0 %v1363_v30  ;;  %v1360_v33 = vsel %vm348_vm1, %v1350_v21, 0.0  ;;  %v1418_v29 = vld [vmem:[%s4868_s1 + $0x248] sm:$0xff]  ;;  %v1419_v21 = vld [vmem:[%s4868_s1 + $0x250] sm:$0xff] }
 0x871   :  { %1361 = vadd.xlane.f32.xlu1 %v1360_v33  ;;  %v1353_v35 = vmul.f32 %v1347_v17, %v1347_v17  ;;  %v3955_v30 = vld [vmem:[%s4868_s1 + $0x68] sm:$0xff]  ;;  %v3957_v33 = vld [vmem:[%s4868_s1 + $0x78] sm:$0xff] }
 0x872   :  { %v1352_v37 = vmul.f32 %v1346_v31, %v1346_v31 }
 0x873   :  { %v1369_v38 = vsel %vm348_vm1, %v1353_v35, 0.0  ;;  %v3958_v35 = vld [vmem:[%s4868_s1 + $0x80] sm:$0xff] }
 0x874   :  { %1370 = vadd.xlane.f32.xlu0 %v1369_v38  ;;  %v1366_v40 = vsel %vm348_vm1, %v1352_v37, 0.0  ;;  %v3959_v37 = vld [vmem:[%s4868_s1 + $0x88] sm:$0xff]  ;;  %v1420_v38 = vld [vmem:[%s4868_s1 + $0x258] sm:$0xff] }
 0x875   :  { %1367 = vadd.xlane.f32.xlu1 %v1366_v40  ;;  %v1421_v40 = vld [vmem:[%s4868_s1 + $0x260] sm:$0xff] }
 0x8f6   :  { %v1359_v42 = vpop.xlane.xlu0 %1358 }
 0x8f7   :  { %v1373_v43 = vmul.f32 0.03125, %v1359_v42  ;;  %v1356_v44 = vpop.xlane.xlu1 %1355  ;;  %v1428_v42 = vld [vmem:[%s4868_s1 + $0x298] sm:$0xff] }
 0x8f8   :  { %v1372_v25 = vmul.f32 0.03125, %v1356_v44  ;;  %v1429_v44 = vld [vmem:[%s4868_s1 + $0x2a0] sm:$0xff] }
 0x8f9   :  { %v1379_v46 = vadd.f32 1e-05, %v1373_v43  ;;  %v3749_v43 = vpack.c.bf16 %v1421_v40, %v1420_v38 }
 0x8fa   :  { %v1378_v27 = vadd.f32 1e-05, %v1372_v25  ;;  %v1422_v25 = vld [vmem:[%s4868_s1 + $0x268] sm:$0xff] }
 0x8fb   :  { %3893 = vrsqrt.f32 %v1379_v46  ;;  %v1423_v46 = vld [vmem:[%s4868_s1 + $0x270] sm:$0xff]  ;;  %3750 = vmatprep.subr.bf16.mxu0 %v3749_v43 }
 0x8fc   :  { %3895 = vrsqrt.f32 %v1378_v27  ;;  %v3765_v27 = vpack.c.bf16 %v1429_v44, %v1428_v42  ;;  %3752 = vmatpush3.bf16.msra.mxu0 %v3749_v43 }
 0x8fd   :  { %v1365_v47 = vpop.xlane.xlu0 %1364 }
 0x8fe   :  { %v1375_v48 = vmul.f32 0.03125, %v1365_v47  ;;  %v1362_v49 = vpop.xlane.xlu1 %1361  ;;  %v3753_v47 = vpack.c.bf16 %v1423_v46, %v1422_v25 }
 0x8ff   :  { %v1374_v32 = vmul.f32 0.03125, %v1362_v49  ;;  %v1431_v49 = vld [vmem:[%s4868_s1 + $0x2b0] sm:$0xff] }
 0x900   :  { %v1381_v34 = vadd.f32 1e-05, %v1375_v48  ;;  %v1430_v48 = vld [vmem:[%s4868_s1 + $0x2a8] sm:$0xff]  ;;  %3754 = vmatprep.subr.bf16.mxu0 %v3753_v47 }
 0x901   :  { %v1380_v51 = vadd.f32 1e-05, %v1374_v32  ;;  %v1371_v52 = vpop.xlane.xlu0 %1370  ;;  %v1424_v32 = vld [vmem:[%s4868_s1 + $0x278] sm:$0xff]  ;;  %3756 = vmatpush3.bf16.msra.mxu0 %v3753_v47 }
 0x902   :  { %3897 = vrsqrt.f32 %v1381_v34  ;;  %v1377_v53 = vmul.f32 0.03125, %v1371_v52  ;;  %v1368_v55 = vpop.xlane.xlu1 %1367  ;;  %v3769_v34 = vpack.c.bf16 %v1431_v49, %v1430_v48  ;;  %v1432_v52 = vld [vmem:[%s4868_s1 + $0x2b8] sm:$0xff] }
 0x903   :  { %3899 = vrsqrt.f32 %v1380_v51  ;;  %v1376_v39 = vmul.f32 0.03125, %v1368_v55  ;;  %v1425_v51 = vld [vmem:[%s4868_s1 + $0x280] sm:$0xff] }
 0x904   :  { %v1383_v56 = vadd.f32 1e-05, %v1377_v53  ;;  %v1433_v53 = vld [vmem:[%s4868_s1 + $0x2c0] sm:$0xff]  ;;  %v3757_v55 = vpack.c.bf16 %v1425_v51, %v1424_v32 }
 0x905   :  { %v3894_v59 = vpop.eup %3893  ;;  %v1382_v60 = vadd.f32 1e-05, %v1376_v39  ;;  %v3773_v39 = vpack.c.bf16 %v1433_v53, %v1432_v52 }
 0x906   :  { %v3896_v62 = vpop.eup %3895  ;;  %v1391_v63 = vmul.f32 %v3894_v59, %v1343_v11  ;;  %3901 = vrsqrt.f32 %v1383_v56  ;;  %v1426_v56 = vld [vmem:[%s4868_s1 + $0x288] sm:$0xff]  ;;  %v1427_v59 = vld [vmem:[%s4868_s1 + $0x290] sm:$0xff]  ;;  %3758 = vmatprep.subr.bf16.mxu0 %v3757_v55 }
 0x907   :  { %v1390_v3 = vmul.f32 %v3896_v62, %v1342_v12  ;;  %3903 = vrsqrt.f32 %v1382_v60  ;;  %v1434_v60 = vld [vmem:[%s4868_s1 + $0x2c8] sm:$0xff]  ;;  %v3761_v62 = vpack.c.bf16 %v1427_v59, %v1426_v56  ;;  %3760 = vmatpush3.bf16.msra.mxu0 %v3757_v55 }
 0x908   :  { %v1401_v2 = vmul.f32 %v2909_v61, %v1391_v63 }
 0x909   :  { %v1400_v7 = vmul.f32 %v2909_v61, %v1390_v3  ;;  %3762 = vmatprep.subr.bf16.mxu0 %v3761_v62 }
 0x90a   :  { %v4468_v8 = vadd.f32 %v2910_v4, %v1401_v2 }
 0x90b   :  { %v4470_v6 = vadd.f32 %v2910_v4, %v1400_v7  ;;  %3764 = vmatpush3.bf16.msra.mxu0 %v3761_v62  ;;  %v1436_v62 = vld [vmem:[%s4868_s1 + $0x2d8] sm:$0xff] }
 0x90c   :  { %v3898_v16 = vpop.eup %3897  ;;  %3782 = vmatprep.subr.bf16.mxu0 %v4205_v18 }
 0x90d   :  { %v3900_v10 = vpop.eup %3899  ;;  %v1393_v19 = vmul.f32 %v3898_v16, %v1345_v15  ;;  %v3729_v41 = vpack.c.bf16 %v4468_v8, %v4470_v6 }
 0x90e   :  { %v1392_v57 = vmul.f32 %v3900_v10, %v1344_v22  ;;  %v1416_v22 = vld [vmem:[%s4868_s1 + $0x238] sm:$0xff] }
 0x90f   :  { %3730 = vmatprep.subr.bf16.mxu1 %v3729_v41  ;;  %v1403_v20 = vmul.f32 %v2909_v61, %v1393_v19  ;;  %v3741_v14 = vpack.c.bf16 %v1417_v26, %v1416_v22 }
 0x910   :  { %v3902_v11 = vpop.eup %3901  ;;  %3732 = vmatpush3.bf16.msra.mxu1 %v3729_v41  ;;  %v1402_v12 = vmul.f32 %v2909_v61, %v1392_v57 }
 0x911   :  { %v3904_v23 = vpop.eup %3903  ;;  %v1395_v54 = vmul.f32 %v3902_v11, %v1347_v17  ;;  %v4474_v13 = vadd.f32 %v2910_v4, %v1403_v20  ;;  %v3745_v17 = vpack.c.bf16 %v1419_v21, %v1418_v29  ;;  %v2917_v29 = vld [vmem:[%s4869_s2 + $0x10] ss:$0 sm:$0xff]  ;;  %v2924_v21 = vld [vmem:[%s4869_s2 + $0x11] ss:$0 sm:$0xff] }
 0x912   :  { %v1394_v1 = vmul.f32 %v3904_v23, %v1346_v31  ;;  %v4476_v58 = vadd.f32 %v2910_v4, %v1402_v12  ;;  %v3956_v31 = vld [vmem:[%s4868_s1 + $0x70] sm:$0xff] }
 0x913   :  { %v1405_v24 = vmul.f32 %v2909_v61, %v1395_v54 }
 0x914   :  { %v3733_v0 = vpack.c.bf16 %v4474_v13, %v4476_v58  ;;  %v1404_v9 = vmul.f32 %v2909_v61, %v1394_v1  ;;  %v1435_v61 = vld [vmem:[%s4868_s1 + $0x2d0] sm:$0xff] }
 0x915   :  { %v4480_v15 = vadd.f32 %v2910_v4, %v1405_v24  ;;  %v3777_v63 = vpack.c.bf16 %v1435_v61, %v1434_v60 }
 0x916   :  { %3734 = vmatprep.subr.bf16.mxu1 %v3733_v0  ;;  %v4488_v5 = vadd.f32 %v2910_v4, %v1404_v9 }
 0x917   :  { %3736 = vmatpush3.bf16.msra.mxu1 %v3733_v0 }
 0x918   :  { %v3737_v28 = vpack.c.bf16 %v4480_v15, %v4488_v5 }
 0x91a   :  { %3738 = vmatprep.subr.bf16.mxu1 %v3737_v28 }
 0x91b   :  { %3740 = vmatpush3.bf16.msra.mxu1 %v3737_v28 }
 0x91c   :  { %3742 = vmatprep.subr.bf16.mxu1 %v3741_v14 }
 0x91e   :  { %3416 = vmatmul.mubr.msk.f32.vlgmr.msra.gmra.mrb[24].mxu1 %vm47_vm0, %v3955_v30 }
 0x91f   :  { %3418 = vmatprep.mubr.msk.f32.mxu1 %vm47_vm0, %v3956_v31  ;;  %3744 = vmatpush3.bf16.msra.mxu1 %v3741_v14 }
 0x920   :  { %3746 = vmatprep.subr.bf16.mxu1 %v3745_v17 }
 0x922   :  { %3419 = vmatmul.mubr.msk.f32.gmra.mrb[26].mxu1 %vm47_vm0, %v3957_v33 }
 0x923   :  { %3421 = vmatprep.mubr.msk.f32.mxu1 %vm47_vm0, %v3958_v35  ;;  %3748 = vmatpush3.bf16.msra.mxu1 %v3745_v17 }
 0x924   :  { %3766 = vmatprep.subr.bf16.mxu1 %v3765_v27 }
 0x926   :  { %3422 = vmatmul.mubr.msk.f32.gmra.mrb[28].mxu1 %vm47_vm0, %v3959_v37 }
 0x927   :  { %3432 = vmatprep.mubr.msk.f32.mxu1 %vm348_vm1, %v4470_v6 }
 0x92a   :  { %3433 = vmatmul.mubr.msk.f32.vlgmr.msra.gmra.mrb[30].mxu1 %vm348_vm1, %v4468_v8 }
 0x92b   :  { %3435 = vmatprep.mubr.msk.f32.mxu1 %vm348_vm1, %v4476_v58  ;;  %3768 = vmatpush3.bf16.msra.mxu1 %v3765_v27 }
 0x92c   :  { %3770 = vmatprep.subr.bf16.mxu1 %v3769_v34 }
 0x92e   :  { %3436 = vmatmul.mubr.msk.f32.gmra.mrb[32].mxu1 %vm348_vm1, %v4474_v13 }
 0x92f   :  { %3438 = vmatprep.mubr.msk.f32.mxu1 %vm348_vm1, %v4488_v5  ;;  %3772 = vmatpush3.bf16.msra.mxu1 %v3769_v34 }
 0x930   :  { %3774 = vmatprep.subr.bf16.mxu1 %v3773_v39 }
 0x932   :  { %3439 = vmatmul.mubr.msk.f32.gmra.mrb[34].mxu1 %vm348_vm1, %v4480_v15 }
 0x933   :  { %3776 = vmatpush3.bf16.msra.mxu1 %v3773_v39 }
 0x934   :  { %3778 = vmatprep.subr.bf16.mxu1 %v3777_v63 }
 0x937   :  { %3780 = vmatpush3.bf16.msra.mxu1 %v3777_v63  ;;  %v1437_v63 = vld [vmem:[%s4868_s1 + $0x2e0] sm:$0xff] }
 0x9f1   :  { %v3417_v3 = vpop.f32.mrb[24].mxu1 }
 0x9f2   :  { %1569 = vrot.lane.b32.xlu0 %v3417_v3, %s3984_s17  ;;  %v1532_v4 = vpop.f32.mrb[25].mxu1  ;;  %v3797_v3 = vpack.c.bf16 %v1437_v63, %v1436_v62 }
 0x9f3   :  { %1567 = vrot.lane.b32.xlu1 %v1532_v4, %s3984_s17  ;;  %v1438_v4 = vld [vmem:[%s4868_s1 + $0x2e8] sm:$0xff] }
 0x9f4   :  { %3798 = vmatprep.subr.bf16.mxu1 %v3797_v3 }
 0x9f5   :  { %v3420_v2 = vpop.f32.mrb[26].mxu1 }
 0x9f6   :  { %v1542_v7 = vpop.f32.mrb[27].mxu1 }
 0x9f7   :  { %1571 = vrot.lane.b32.xlu1 %v1542_v7, %s3984_s17 }
 0x9f9   :  { %v3423_v16 = vpop.f32.mrb[28].mxu1 }
 0x9fa   :  { %v1552_v10 = vpop.f32.mrb[29].mxu1 }
 0x9fb   :  { %1573 = vrot.lane.b32.xlu1 %v3420_v2, %s3984_s17  ;;  %1575 = vrot.lane.b32.xlu0 %v1552_v10, %s3984_s17  ;;  %v1439_v2 = vld [vmem:[%s4868_s1 + $0x2f0] sm:$0xff]  ;;  %v1441_v10 = vld [vmem:[%s4868_s1 + $0x300] sm:$0xff] }
 0x9fc   :  { %v3801_v7 = vpack.c.bf16 %v1439_v2, %v1438_v4 }
 0x9fd   :  { %v3434_v19 = vpop.f32.mrb[30].mxu1 }
 0x9fe   :  { %v1679_v41 = vpop.f32.mrb[31].mxu1  ;;  %v1685_v30 = vadd.f32 %v3434_v19, %v2917_v29 }
 0x9ff   :  { %1577 = vrot.lane.b32.xlu1 %v3423_v16, %s3984_s17  ;;  %v1680_v37 = vadd.f32 %v2917_v29, %v1679_v41  ;;  %v1440_v16 = vld [vmem:[%s4868_s1 + $0x2f8] sm:$0xff]  ;;  %v1442_v41 = vld [vmem:[%s4868_s1 + $0x308] sm:$0xff] }
 0xa00   :  { %v3805_v19 = vpack.c.bf16 %v1441_v10, %v1440_v16 }
 0xa01   :  { %v3437_v57 = vpop.f32.mrb[32].mxu1 }
 0xa02   :  { %v1689_v20 = vpop.f32.mrb[33].mxu1  ;;  %v1695_v44 = vadd.f32 %v3437_v57, %v2917_v29  ;;  %v1443_v57 = vld [vmem:[%s4868_s1 + $0x310] sm:$0xff] }
 0xa03   :  { %v1690_v47 = vadd.f32 %v2917_v29, %v1689_v20  ;;  %v3809_v20 = vpack.c.bf16 %v1443_v57, %v1442_v41 }
 0xa05   :  { %v3440_v11 = vpop.f32.mrb[34].mxu1 }
 0xa06   :  { %v1699_v12 = vpop.f32.mrb[35].mxu1  ;;  %v1705_v52 = vadd.f32 %v3440_v11, %v2917_v29 }
 0xa07   :  { %v1700_v56 = vadd.f32 %v2917_v29, %v1699_v12 }
 0xa64   :  { %v1570_v23 = vpop.permute.xlu0 %1569 }
 0xa65   :  { %v1568_v54 = vpop.permute.xlu1 %1567  ;;  %v1586_v24 = vsel %vm348_vm1, %v4468_v8, %v1570_v23 }
 0xa66   :  { %v1585_v1 = vsel %vm348_vm1, %v4470_v6, %v1568_v54 }
 0xa67   :  { %3457 = vmatprep.mubr.msk.f32.mxu0 %vm476_vm2, %v1585_v1  ;;  %3482 = vmatprep.mubr.msk.f32.mxu1 %vm476_vm2, %v1585_v1 }
 0xa68   :  { %3458 = vmatmul.mubr.msk.f32.vlgmr.msra.gmra.mrb[30].mxu0 %vm476_vm2, %v1586_v24  ;;  %3483 = vmatmul.mubr.msk.f32.vlgmr.msra.gmra.mrb[36].mxu1 %vm476_vm2, %v1586_v24 }
 0xa69   :  { %v1572_v0 = vpop.permute.xlu1 %1571  ;;  %3784 = vmatpush3.bf16.msra.mxu0 %v4205_v18  ;;  %3800 = vmatpush3.bf16.msra.mxu1 %v3797_v3 }
 0xa6a   :  { %v1587_v9 = vsel %vm348_vm1, %v4476_v58, %v1572_v0  ;;  %3786 = vmatprep.subr.bf16.mxu0 %v4227_v36  ;;  %3802 = vmatprep.subr.bf16.mxu1 %v3801_v7 }
 0xa6b   :  { %3460 = vmatprep.mubr.msk.f32.mxu0 %vm476_vm2, %v1587_v9  ;;  %3485 = vmatprep.mubr.msk.f32.mxu1 %vm476_vm2, %v1587_v9 }
 0xa6d   :  { %v1574_v22 = vpop.permute.xlu1 %1573  ;;  %v1576_v26 = vpop.permute.xlu0 %1575  ;;  %3788 = vmatpush3.bf16.msra.mxu0 %v4227_v36  ;;  %3804 = vmatpush3.bf16.msra.mxu1 %v3801_v7 }
 0xa6e   :  { %v1588_v28 = vsel %vm348_vm1, %v4474_v13, %v1574_v22  ;;  %v1589_v14 = vsel %vm348_vm1, %v4488_v5, %v1576_v26  ;;  %3790 = vmatprep.subr.bf16.mxu0 %v4245_v45  ;;  %3806 = vmatprep.subr.bf16.mxu1 %v3805_v19 }
 0xa6f   :  { %3461 = vmatmul.mubr.msk.f32.gmra.mrb[32].mxu0 %vm476_vm2, %v1588_v28  ;;  %3486 = vmatmul.mubr.msk.f32.gmra.mrb[38].mxu1 %vm476_vm2, %v1588_v28 }
 0xa70   :  { %3463 = vmatprep.mubr.msk.f32.mxu0 %vm476_vm2, %v1589_v14  ;;  %3488 = vmatprep.mubr.msk.f32.mxu1 %vm476_vm2, %v1589_v14 }
 0xa71   :  { %v1578_v18 = vpop.permute.xlu1 %1577  ;;  %3792 = vmatpush3.bf16.msra.mxu0 %v4245_v45  ;;  %3808 = vmatpush3.bf16.msra.mxu1 %v3805_v19 }
 0xa72   :  { %v1590_v36 = vsel %vm348_vm1, %v4480_v15, %v1578_v18  ;;  %3794 = vmatprep.subr.bf16.mxu0 %v4264_v50  ;;  %3810 = vmatprep.subr.bf16.mxu1 %v3809_v20 }
 0xa73   :  { %3464 = vmatmul.mubr.msk.f32.gmra.mrb[34].mxu0 %vm476_vm2, %v1590_v36  ;;  %3489 = vmatmul.mubr.msk.f32.gmra.mrb[40].mxu1 %vm476_vm2, %v1590_v36 }
 0xa75   :  { %3796 = vmatpush3.bf16.msra.mxu0 %v4264_v50  ;;  %3812 = vmatpush3.bf16.msra.mxu1 %v3809_v20 }
 0xb3b   :  { %v3459_v45 = vpop.f32.mrb[30].mxu0  ;;  %v4622_v17 = vpop.f32.mrb[36].mxu1 }
 0xb3c   :  { %v1802_v31 = vadd.f32 %v3459_v45, %v2924_v21  ;;  %v1796_v33 = vpop.f32.mrb[31].mxu0  ;;  %v4624_v35 = vpop.f32.mrb[37].mxu1 }
 0xb3d   :  { %v1797_v38 = vadd.f32 %v2924_v21, %v1796_v33  ;;  %v2931_v33 = vld [vmem:[%s4869_s2 + $0x12] ss:$0 sm:$0xff] }
 0xb3e   :  { %v1925_v40 = vmul.f32 %v1802_v31, %v1685_v30 }
 0xb3f   :  { %v1924_v50 = vmul.f32 %v1797_v38, %v1680_v37 }
 0xb41   :  { %3507 = vmatprep.mubr.msk.f32.mxu0 %vm476_vm2, %v1924_v50  ;;  %v1901_v50 = vadd.f32 %v4622_v17, %v2931_v33 }
 0xb42   :  { %v3462_v42 = vpop.f32.mrb[32].mxu0  ;;  %v4627_v43 = vpop.f32.mrb[38].mxu1  ;;  %3508 = vmatmul.mubr.msk.f32.vlgmr.msra.gmra.mrb[36].mxu0 %vm476_vm2, %v1925_v40 }
 0xb43   :  { %v1812_v25 = vadd.f32 %v3462_v42, %v2924_v21  ;;  %v1806_v46 = vpop.f32.mrb[33].mxu0  ;;  %v4630_v27 = vpop.f32.mrb[39].mxu1 }
 0xb44   :  { %v1807_v48 = vadd.f32 %v2924_v21, %v1806_v46 }
 0xb45   :  { %v1927_v49 = vmul.f32 %v1812_v25, %v1695_v44  ;;  %v1896_v25 = vadd.f32 %v2931_v33, %v4624_v35 }
 0xb46   :  { %v1926_v32 = vmul.f32 %v1807_v48, %v1690_v47  ;;  %v3465_v34 = vpop.f32.mrb[34].mxu0  ;;  %v4632_v51 = vpop.f32.mrb[40].mxu1 }
 0xb47   :  { %v1822_v53 = vadd.f32 %v3465_v34, %v2924_v21  ;;  %v1816_v55 = vpop.f32.mrb[35].mxu0  ;;  %v4634_v39 = vpop.f32.mrb[41].mxu1  ;;  %v1921_v35 = vadd.f32 %v4632_v51, %v2931_v33 }
 0xb48   :  { %v1817_v59 = vadd.f32 %v2924_v21, %v1816_v55  ;;  %3510 = vmatprep.mubr.msk.f32.mxu0 %vm476_vm2, %v1926_v32  ;;  %v1911_v32 = vadd.f32 %v4627_v43, %v2931_v33 }
 0xb49   :  { %v1929_v60 = vmul.f32 %v1822_v53, %v1705_v52  ;;  %3511 = vmatmul.mubr.msk.f32.gmra.mrb[38].mxu0 %vm476_vm2, %v1927_v49  ;;  %v1906_v52 = vadd.f32 %v2931_v33, %v4630_v27  ;;  %v2950_v27 = vld [vmem:[%s4869_s2 + $0x13] ss:$0 sm:$0xff] }
 0xb4a   :  { %v1928_v61 = vmul.f32 %v1817_v59, %v1700_v56  ;;  %v1916_v59 = vadd.f32 %v2931_v33, %v4634_v39 }
 0xb4c   :  { %3513 = vmatprep.mubr.msk.f32.mxu0 %vm476_vm2, %v1928_v61 }
 0xb4d   :  { %3514 = vmatmul.mubr.msk.f32.gmra.mrb[40].mxu0 %vm476_vm2, %v1929_v60 }
 0xc15   :  { %v3509_v11 = vpop.f32.mrb[36].mxu0 }
 0xc16   :  { %v2045_v12 = vmul.f32 1.442695, %v3509_v11  ;;  %v2014_v23 = vpop.f32.mrb[37].mxu0 }
 0xc17   :  { %v2043_v54 = vmul.f32 1.442695, %v2014_v23 }
 0xc18   :  { %3905 = vpow2.f32 %v2045_v12 }
 0xc19   :  { %3907 = vpow2.f32 %v2043_v54 }
 0xc1c   :  { %v3512_v1 = vpop.f32.mrb[38].mxu0 }
 0xc1d   :  { %v2049_v24 = vmul.f32 1.442695, %v3512_v1  ;;  %v2024_v0 = vpop.f32.mrb[39].mxu0 }
 0xc1e   :  { %v2047_v9 = vmul.f32 1.442695, %v2024_v0 }
 0xc1f   :  { %3909 = vpow2.f32 %v2049_v24 }
 0xc20   :  { %3911 = vpow2.f32 %v2047_v9  ;;  %v3515_v22 = vpop.f32.mrb[40].mxu0 }
 0xc21   :  { %v2053_v26 = vmul.f32 1.442695, %v3515_v22  ;;  %v2034_v28 = vpop.f32.mrb[41].mxu0 }
 0xc22   :  { %v3906_v14 = vpop.eup %3905  ;;  %v2051_v18 = vmul.f32 1.442695, %v2034_v28 }
 0xc23   :  { %v3908_v36 = vpop.eup %3907  ;;  %v2056_v29 = vadd.f32 1.0, %v3906_v14  ;;  %3913 = vpow2.f32 %v2053_v26 }
 0xc24   :  { %v2055_v21 = vadd.f32 1.0, %v3908_v36  ;;  %3915 = vpow2.f32 %v2051_v18 }
 0xc25   :  { %3917 = vrcp.f32 %v2056_v29 }
 0xc26   :  { %3919 = vrcp.f32 %v2055_v21 }
 0xc29   :  { %v3910_v45 = vpop.eup %3909 }
 0xc2a   :  { %v3912_v30 = vpop.eup %3911  ;;  %v2058_v31 = vadd.f32 1.0, %v3910_v45 }
 0xc2b   :  { %v2057_v37 = vadd.f32 1.0, %v3912_v30 }
 0xc2c   :  { %3921 = vrcp.f32 %v2058_v31 }
 0xc2d   :  { %v3914_v38 = vpop.eup %3913  ;;  %3923 = vrcp.f32 %v2057_v37 }
 0xc2e   :  { %v3916_v40 = vpop.eup %3915  ;;  %v2060_v42 = vadd.f32 1.0, %v3914_v38 }
 0xc2f   :  { %v3918_v44 = vpop.eup %3917  ;;  %v2059_v46 = vadd.f32 1.0, %v3916_v40 }
 0xc30   :  { %v3920_v47 = vpop.eup %3919  ;;  %v2068_v48 = vmul.f32 %v3918_v44, %v1901_v50  ;;  %3925 = vrcp.f32 %v2060_v42 }
 0xc31   :  { %3927 = vrcp.f32 %v2059_v46  ;;  %v2067_v49 = vmul.f32 %v3920_v47, %v1896_v25 }
 0xc33   :  { %3532 = vmatprep.mubr.msk.f32.mxu1 %vm476_vm2, %v2067_v49 }
 0xc34   :  { %3533 = vmatmul.mubr.msk.f32.vlgmr.msra.gmra.mrb[42].mxu1 %vm476_vm2, %v2068_v48 }
 0xc36   :  { %v3922_v34 = vpop.eup %3921 }
 0xc37   :  { %v3924_v17 = vpop.eup %3923  ;;  %v2070_v53 = vmul.f32 %v3922_v34, %v1911_v32 }
 0xc38   :  { %v2069_v55 = vmul.f32 %v3924_v17, %v1906_v52  ;;  %v1444_v17 = vld [vmem:[%s4868_s1 + $0x318] sm:$0xff] }
 0xc3a   :  { %v3926_v56 = vpop.eup %3925  ;;  %3535 = vmatprep.mubr.msk.f32.mxu1 %vm476_vm2, %v2069_v55 }
 0xc3b   :  { %v3928_v60 = vpop.eup %3927  ;;  %3536 = vmatmul.mubr.msk.f32.gmra.mrb[44].mxu1 %vm476_vm2, %v2070_v53  ;;  %v2072_v61 = vmul.f32 %v3926_v56, %v1921_v35  ;;  %v1445_v53 = vld [vmem:[%s4868_s1 + $0x320] sm:$0xff]  ;;  %v1446_v35 = vld [vmem:[%s4868_s1 + $0x328] sm:$0xff]  ;;  %v1447_v56 = vld [vmem:[%s4868_s1 + $0x330] sm:$0xff] }
 0xc3c   :  { %v2071_v62 = vmul.f32 %v3928_v60, %v1916_v59  ;;  %v3813_v55 = vpack.c.bf16 %v1445_v53, %v1444_v17  ;;  %v3817_v59 = vpack.c.bf16 %v1447_v56, %v1446_v35  ;;  %v1448_v60 = vld [vmem:[%s4868_s1 + $0x338] sm:$0xff] }
 0xc3e   :  { %3538 = vmatprep.mubr.msk.f32.mxu1 %vm476_vm2, %v2071_v62  ;;  %3814 = vmatprep.subr.bf16.mxu0 %v3813_v55  ;;  %v1450_v62 = vld [vmem:[%s4868_s1 + $0x348] sm:$0xff] }
 0xc3f   :  { %3539 = vmatmul.mubr.msk.f32.gmra.mrb[46].mxu1 %vm476_vm2, %v2072_v61  ;;  %3816 = vmatpush3.bf16.msra.mxu0 %v3813_v55  ;;  %v1449_v61 = vld [vmem:[%s4868_s1 + $0x340] sm:$0xff] }
 0xc40   :  { %3818 = vmatprep.subr.bf16.mxu0 %v3817_v59 }
 0xc43   :  { %3820 = vmatpush3.bf16.msra.mxu0 %v3817_v59 }
 0xd07   :  { %v3534_v43 = vpop.f32.mrb[42].mxu1 }
 0xd08   :  { %v2187_v51 = vadd.f32 %v3534_v43, %v4468_v8  ;;  %v2157_v63 = vpop.f32.mrb[43].mxu1  ;;  %v3821_v43 = vpack.c.bf16 %v1449_v61, %v1448_v60 }
 0xd09   :  { %v2186_v39 = vadd.f32 %v2157_v63, %v4470_v6  ;;  %v1452_v63 = vld [vmem:[%s4868_s1 + $0x358] sm:$0xff] }
 0xd0a   :  { %v2197_v3 = vadd.f32 %v2950_v27, %v2187_v51  ;;  %3822 = vmatprep.subr.bf16.mxu1 %v3821_v43 }
 0xd0b   :  { %v2196_v4 = vadd.f32 %v2950_v27, %v2186_v39  ;;  %v1453_v39 = vld [vmem:[%s4868_s1 + $0x360] sm:$0xff]  ;;  %3824 = vmatpush3.bf16.msra.mxu1 %v3821_v43 }
 0xd0c   :  { %v2205_v2 = vsel %vm348_vm1, %v2197_v3, 0.0 }
 0xd0d   :  { %2206 = vadd.xlane.f32.xlu1 %v2205_v2  ;;  %v2202_v7 = vsel %vm348_vm1, %v2196_v4, 0.0 }
 0xd0e   :  { %2203 = vadd.xlane.f32.xlu0 %v2202_v7  ;;  %v3537_v16 = vpop.f32.mrb[44].mxu1 }
 0xd0f   :  { %v2167_v10 = vpop.f32.mrb[45].mxu1  ;;  %v2189_v19 = vadd.f32 %v3537_v16, %v4474_v13 }
 0xd10   :  { %v2188_v41 = vadd.f32 %v2167_v10, %v4476_v58 }
 0xd11   :  { %v2199_v23 = vadd.f32 %v2950_v27, %v2189_v19 }
 0xd12   :  { %v3540_v57 = vpop.f32.mrb[46].mxu1  ;;  %v2198_v20 = vadd.f32 %v2950_v27, %v2188_v41 }
 0xd13   :  { %v2177_v8 = vpop.f32.mrb[47].mxu1  ;;  %v2191_v11 = vadd.f32 %v3540_v57, %v4480_v15  ;;  %v2211_v1 = vsel %vm348_vm1, %v2199_v23, 0.0 }
 0xd14   :  { %v2190_v6 = vadd.f32 %v2177_v8, %v4488_v5  ;;  %v2208_v12 = vsel %vm348_vm1, %v2198_v20, 0.0 }
 0xd15   :  { %2209 = vadd.xlane.f32.xlu0 %v2208_v12  ;;  %v2201_v0 = vadd.f32 %v2950_v27, %v2191_v11 }
 0xd16   :  { %v2200_v54 = vadd.f32 %v2950_v27, %v2190_v6  ;;  %v1451_v27 = vld [vmem:[%s4868_s1 + $0x350] sm:$0xff] }
 0xd17   :  { %v2217_v13 = vsel %vm348_vm1, %v2201_v0, 0.0  ;;  %v3825_v51 = vpack.c.bf16 %v1451_v27, %v1450_v62 }
 0xd18   :  { %v2214_v24 = vsel %vm348_vm1, %v2200_v54, 0.0 }
 0xd19   :  { %2212 = vadd.xlane.f32.xlu0 %v2211_v1  ;;  %2215 = vadd.xlane.f32.xlu1 %v2214_v24 }
 0xd1a   :  { %3826 = vmatprep.subr.bf16.mxu1 %v3825_v51 }
 0xd1b   :  { %3828 = vmatpush3.bf16.msra.mxu1 %v3825_v51 }
 0xd1d   :  { %2218 = vadd.xlane.f32.xlu0 %v2217_v13 }
 0xd9a   :  { %v2207_v58 = vpop.xlane.xlu1 %2206 }
 0xd9b   :  { %v2221_v9 = vmul.f32 0.03125, %v2207_v58  ;;  %v2204_v15 = vpop.xlane.xlu0 %2203 }
 0xd9c   :  { %v2220_v22 = vmul.f32 0.03125, %v2204_v15 }
 0xd9d   :  { %v4694_v5 = vsub.f32 %v2197_v3, %v2221_v9  ;;  %v3829_v3 = vpack.c.bf16 %v1453_v39, %v1452_v63 }
 0xd9e   :  { %v4696_v26 = vsub.f32 %v2196_v4, %v2220_v22  ;;  %v2952_v22 = vld [vmem:[%s4869_s2 + $0x17] ss:$0 sm:$0xff] }
 0xd9f   :  { %v2233_v28 = vmul.f32 %v4694_v5, %v4694_v5  ;;  %3830 = vmatprep.subr.bf16.mxu1 %v3829_v3 }
 0xda0   :  { %v2232_v14 = vmul.f32 %v4696_v26, %v4696_v26  ;;  %3832 = vmatpush3.bf16.msra.mxu1 %v3829_v3 }
 0xda1   :  { %v2241_v18 = vsel %vm348_vm1, %v2233_v28, 0.0 }
 0xda2   :  { %v2210_v36 = vpop.xlane.xlu0 %2209  ;;  %2242 = vadd.xlane.f32.xlu0 %v2241_v18  ;;  %v2238_v29 = vsel %vm348_vm1, %v2232_v14, 0.0 }
 0xda3   :  { %v2222_v21 = vmul.f32 0.03125, %v2210_v36  ;;  %2239 = vadd.xlane.f32.xlu1 %v2238_v29 }
 0xda5   :  { %v4704_v45 = vsub.f32 %v2198_v20, %v2222_v21 }
 0xda6   :  { %v2213_v30 = vpop.xlane.xlu0 %2212  ;;  %v2216_v31 = vpop.xlane.xlu1 %2215 }
 0xda7   :  { %v2223_v33 = vmul.f32 0.03125, %v2213_v30  ;;  %v2224_v37 = vmul.f32 0.03125, %v2216_v31  ;;  %v2234_v38 = vmul.f32 %v4704_v45, %v4704_v45 }
 0xda9   :  { %v4708_v40 = vsub.f32 %v2199_v23, %v2223_v33  ;;  %v4710_v50 = vsub.f32 %v2200_v54, %v2224_v37  ;;  %v2244_v42 = vsel %vm348_vm1, %v2234_v38, 0.0  ;;  %v2951_v54 = vld [vmem:[%s4869_s2 + $0x16] ss:$0 sm:$0xff] }
 0xdaa   :  { %v2219_v44 = vpop.xlane.xlu0 %2218  ;;  %2245 = vadd.xlane.f32.xlu1 %v2244_v42 }
 0xdab   :  { %v2225_v25 = vmul.f32 0.03125, %v2219_v44  ;;  %v2235_v46 = vmul.f32 %v4708_v40, %v4708_v40  ;;  %v2236_v47 = vmul.f32 %v4710_v50, %v4710_v50 }
 0xdad   :  { %v4717_v48 = vsub.f32 %v2201_v0, %v2225_v25  ;;  %v2247_v49 = vsel %vm348_vm1, %v2235_v46, 0.0  ;;  %v2250_v32 = vsel %vm348_vm1, %v2236_v47, 0.0 }
 0xdae   :  { %2248 = vadd.xlane.f32.xlu0 %v2247_v49  ;;  %2251 = vadd.xlane.f32.xlu1 %v2250_v32 }
 0xdaf   :  { %v2237_v34 = vmul.f32 %v4717_v48, %v4717_v48 }
 0xdb1   :  { %v2253_v52 = vsel %vm348_vm1, %v2237_v34, 0.0 }
 0xdb2   :  { %2254 = vadd.xlane.f32.xlu0 %v2253_v52 }
 0xe2f   :  { %v2243_v4 = vpop.xlane.xlu0 %2242 }
 0xe30   :  { %v2257_v2 = vmul.f32 0.03125, %v2243_v4  ;;  %v2240_v7 = vpop.xlane.xlu1 %2239 }
 0xe31   :  { %v2256_v16 = vmul.f32 0.03125, %v2240_v7 }
 0xe32   :  { %v2263_v10 = vadd.f32 1e-05, %v2257_v2 }
 0xe33   :  { %v2262_v19 = vadd.f32 1e-05, %v2256_v16  ;;  %v2966_v16 = vld [vmem:[%s4869_s2 + $0x15] ss:$0 sm:$0xff] }
 0xe34   :  { %3929 = vrsqrt.f32 %v2263_v10 }
 0xe35   :  { %3931 = vrsqrt.f32 %v2262_v19 }
 0xe37   :  { %v2246_v41 = vpop.xlane.xlu1 %2245 }
 0xe38   :  { %v2258_v57 = vmul.f32 0.03125, %v2246_v41 }
 0xe3a   :  { %v2264_v20 = vadd.f32 1e-05, %v2258_v57 }
 0xe3b   :  { %v2249_v8 = vpop.xlane.xlu0 %2248  ;;  %v2252_v11 = vpop.xlane.xlu1 %2251 }
 0xe3c   :  { %3933 = vrsqrt.f32 %v2264_v20  ;;  %v2259_v6 = vmul.f32 0.03125, %v2249_v8  ;;  %v2260_v12 = vmul.f32 0.03125, %v2252_v11 }
 0xe3e   :  { %v3930_v23 = vpop.eup %3929  ;;  %v2265_v1 = vadd.f32 1e-05, %v2259_v6  ;;  %v2266_v24 = vadd.f32 1e-05, %v2260_v12 }
 0xe3f   :  { %v3932_v0 = vpop.eup %3931  ;;  %v2275_v13 = vmul.f32 %v3930_v23, %v4694_v5  ;;  %v2255_v58 = vpop.xlane.xlu0 %2254 }
 0xe40   :  { %3935 = vrsqrt.f32 %v2265_v1  ;;  %v2261_v9 = vmul.f32 0.03125, %v2255_v58  ;;  %v2274_v15 = vmul.f32 %v3932_v0, %v4696_v26 }
 0xe41   :  { %v2285_v28 = vmul.f32 %v2951_v54, %v2275_v13  ;;  %3937 = vrsqrt.f32 %v2266_v24 }
 0xe42   :  { %v2267_v14 = vadd.f32 1e-05, %v2261_v9  ;;  %v2284_v18 = vmul.f32 %v2951_v54, %v2274_v15 }
 0xe43   :  { %v2295_v29 = vadd.f32 %v2952_v22, %v2285_v28 }
 0xe44   :  { %3939 = vrsqrt.f32 %v2267_v14  ;;  %v2294_v36 = vadd.f32 %v2952_v22, %v2284_v18 }
 0xe46   :  { %v3934_v21 = vpop.eup %3933  ;;  %3549 = vmatprep.mubr.msk.f32.mxu0 %vm348_vm1, %v2294_v36 }
 0xe47   :  { %3550 = vmatmul.mubr.msk.f32.vlgmr.msra.gmra.mrb[42].mxu0 %vm348_vm1, %v2295_v29  ;;  %v2276_v5 = vmul.f32 %v3934_v21, %v4704_v45 }
 0xe49   :  { %v2286_v30 = vmul.f32 %v2951_v54, %v2276_v5 }
 0xe4a   :  { %v3936_v26 = vpop.eup %3935 }
 0xe4b   :  { %v3938_v31 = vpop.eup %3937  ;;  %v2296_v33 = vadd.f32 %v2952_v22, %v2286_v30  ;;  %v2277_v37 = vmul.f32 %v3936_v26, %v4708_v40  ;;  %v1454_v40 = vld [vmem:[%s4868_s1 + $0x368] sm:$0xff] }
 0xe4c   :  { %v2278_v38 = vmul.f32 %v3938_v31, %v4710_v50  ;;  %v1455_v50 = vld [vmem:[%s4868_s1 + $0x370] sm:$0xff] }
 0xe4d   :  { %3552 = vmatprep.mubr.msk.f32.mxu0 %vm348_vm1, %v2296_v33  ;;  %v2287_v42 = vmul.f32 %v2951_v54, %v2277_v37  ;;  %v3833_v34 = vpack.c.bf16 %v1455_v50, %v1454_v40 }
 0xe4e   :  { %v3940_v44 = vpop.eup %3939  ;;  %v2288_v25 = vmul.f32 %v2951_v54, %v2278_v38 }
 0xe4f   :  { %v2297_v46 = vadd.f32 %v2952_v22, %v2287_v42  ;;  %v2279_v47 = vmul.f32 %v3940_v44, %v4717_v48  ;;  %3834 = vmatprep.subr.bf16.mxu1 %v3833_v34  ;;  %v2953_v48 = vld [vmem:[%s4869_s2 + $0x14] ss:$0 sm:$0xff] }
 0xe50   :  { %v2298_v49 = vadd.f32 %v2952_v22, %v2288_v25  ;;  %3836 = vmatpush3.bf16.msra.mxu1 %v3833_v34 }
 0xe51   :  { %3553 = vmatmul.mubr.msk.f32.gmra.mrb[44].mxu0 %vm348_vm1, %v2297_v46  ;;  %v2289_v45 = vmul.f32 %v2951_v54, %v2279_v47 }
 0xe52   :  { %3555 = vmatprep.mubr.msk.f32.mxu0 %vm348_vm1, %v2298_v49 }
 0xe53   :  { %v2299_v32 = vadd.f32 %v2952_v22, %v2289_v45 }
 0xe55   :  { %3556 = vmatmul.mubr.msk.f32.gmra.mrb[46].mxu0 %vm348_vm1, %v2299_v32 }
 0xf1a   :  { %v3551_v52 = vpop.f32.mrb[42].mxu0 }
 0xf1b   :  { %v2394_v17 = vadd.f32 %v3551_v52, %v2953_v48  ;;  %v2388_v53 = vpop.f32.mrb[43].mxu0 }
 0xf1c   :  { %v2389_v55 = vadd.f32 %v2953_v48, %v2388_v53 }
 0xf1d   :  { %v2418_v56 = vmax.f32 %v2394_v17, 0.0 }
 0xf1e   :  { %v2417_v35 = vmax.f32 %v2389_v55, 0.0 }
 0xf20   :  { %3574 = vmatprep.mubr.msk.f32.mxu1 %vm476_vm2, %v2417_v35 }
 0xf21   :  { %3575 = vmatmul.mubr.msk.f32.vlgmr.msra.gmra.mrb[48].mxu1 %vm476_vm2, %v2418_v56 }
 0xf24   :  { %v3554_v59 = vpop.f32.mrb[44].mxu0 }
 0xf25   :  { %v2404_v60 = vadd.f32 %v3554_v59, %v2953_v48  ;;  %v2398_v61 = vpop.f32.mrb[45].mxu0 }
 0xf26   :  { %v2399_v62 = vadd.f32 %v2953_v48, %v2398_v61 }
 0xf27   :  { %v2420_v51 = vmax.f32 %v2404_v60, 0.0 }
 0xf28   :  { %v2419_v43 = vmax.f32 %v2399_v62, 0.0  ;;  %v3557_v27 = vpop.f32.mrb[46].mxu0  ;;  %v3985_v62 = vmov 0.0|0.0  }
 0xf29   :  { %v2414_v63 = vadd.f32 %v3557_v27, %v2953_v48  ;;  %v2408_v39 = vpop.f32.mrb[47].mxu0  ;;  %3837 = vmatprep.subr.bf16.mxu0 %v3985_v62 }
 0xf2a   :  { %v2409_v3 = vadd.f32 %v2953_v48, %v2408_v39  ;;  %3577 = vmatprep.mubr.msk.f32.mxu1 %vm476_vm2, %v2419_v43  ;;  %v3987_v43 = vmov 0.0  }
 0xf2b   :  { %3578 = vmatmul.mubr.msk.f32.gmra.mrb[50].mxu1 %vm476_vm2, %v2420_v51  ;;  %v2422_v2 = vmax.f32 %v2414_v63, 0.0  ;;  %3595 = vmatprep.mubr.msk.f32.mxu0 %vm3986_vm3, %v3987_v43 }
 0xf2c   :  { %v2421_v4 = vmax.f32 %v2409_v3, 0.0 }
 0xf2e   :  { %3580 = vmatprep.mubr.msk.f32.mxu1 %vm476_vm2, %v2421_v4 }
 0xf2f   :  { %3581 = vmatmul.mubr.msk.f32.gmra.mrb[52].mxu1 %vm476_vm2, %v2422_v2 }
 0xff4   :  { %v3576_v7 = vpop.f32.mrb[48].mxu1 }
 0xff5   :  { %v2537_v10 = vadd.f32 %v3576_v7, %v2295_v29  ;;  %v2507_v19 = vpop.f32.mrb[49].mxu1 }
 0xff6   :  { %v2536_v41 = vadd.f32 %v2507_v19, %v2294_v36 }
 0xff7   :  { %v2547_v57 = vadd.f32 %v2966_v16, %v2537_v10 }
 0xff8   :  { %v2546_v20 = vadd.f32 %v2966_v16, %v2536_v41 }
 0xff9   :  { %v2555_v8 = vsel %vm348_vm1, %v2547_v57, 0.0 }
 0xffa   :  { %2556 = vadd.xlane.f32.xlu0 %v2555_v8  ;;  %v2552_v11 = vsel %vm348_vm1, %v2546_v20, 0.0 }
 0xffb   :  { %2553 = vadd.xlane.f32.xlu1 %v2552_v11 }
 0xffe   :  { %v3579_v6 = vpop.f32.mrb[50].mxu1 }
 0xfff   :  { %v2539_v12 = vadd.f32 %v3579_v6, %v2297_v46  ;;  %v2517_v23 = vpop.f32.mrb[51].mxu1  ;;  %v2967_v6 = vld [vmem:[%s4869_s2 + $0x18] ss:$0 sm:$0xff] }
0x1000   :  { %v2538_v54 = vadd.f32 %v2517_v23, %v2296_v33 }
0x1001   :  { %v2549_v1 = vadd.f32 %v2966_v16, %v2539_v12 }
0x1002   :  { %v3582_v24 = vpop.f32.mrb[52].mxu1  ;;  %v2548_v0 = vadd.f32 %v2966_v16, %v2538_v54 }
0x1003   :  { %v2541_v13 = vadd.f32 %v3582_v24, %v2299_v32  ;;  %v2527_v58 = vpop.f32.mrb[53].mxu1  ;;  %v2561_v9 = vsel %vm348_vm1, %v2549_v1, 0.0 }
0x1004   :  { %v2540_v15 = vadd.f32 %v2527_v58, %v2298_v49  ;;  %2562 = vadd.xlane.f32.xlu0 %v2561_v9  ;;  %v2558_v22 = vsel %vm348_vm1, %v2548_v0, 0.0 }
0x1005   :  { %2559 = vadd.xlane.f32.xlu1 %v2558_v22  ;;  %v2551_v28 = vadd.f32 %v2966_v16, %v2541_v13 }
0x1006   :  { %v2550_v14 = vadd.f32 %v2966_v16, %v2540_v15 }
0x1007   :  { %v2567_v18 = vsel %vm348_vm1, %v2551_v28, 0.0 }
0x1008   :  { %2568 = vadd.xlane.f32.xlu0 %v2567_v18  ;;  %v2564_v36 = vsel %vm348_vm1, %v2550_v14, 0.0 }
0x1009   :  { %2565 = vadd.xlane.f32.xlu1 %v2564_v36 }
0x1087   :  { %v2557_v29 = vpop.xlane.xlu0 %2556 }
0x1088   :  { %v2571_v21 = vmul.f32 0.03125, %v2557_v29  ;;  %v2554_v5 = vpop.xlane.xlu1 %2553 }
0x1089   :  { %v2570_v30 = vmul.f32 0.03125, %v2554_v5 }
0x108a   :  { %v2577_v26 = vsub.f32 %v2547_v57, %v2571_v21 }
0x108b   :  { %v2576_v31 = vsub.f32 %v2546_v20, %v2570_v30 }
0x108c   :  { %v2583_v33 = vmul.f32 %v2577_v26, %v2577_v26 }
0x108d   :  { %v2582_v37 = vmul.f32 %v2576_v31, %v2576_v31 }
0x108e   :  { %v2591_v38 = vsel %vm348_vm1, %v2583_v33, 0.0 }
0x108f   :  { %2592 = vadd.xlane.f32.xlu0 %v2591_v38  ;;  %v2588_v42 = vsel %vm348_vm1, %v2582_v37, 0.0 }
0x1090   :  { %2589 = vadd.xlane.f32.xlu1 %v2588_v42 }
0x1091   :  { %v2563_v44 = vpop.xlane.xlu0 %2562 }
0x1092   :  { %v2573_v25 = vmul.f32 0.03125, %v2563_v44  ;;  %v2560_v46 = vpop.xlane.xlu1 %2559 }
0x1093   :  { %v2572_v47 = vmul.f32 0.03125, %v2560_v46 }
0x1094   :  { %v4798_v49 = vsub.f32 %v2549_v1, %v2573_v25 }
0x1095   :  { %v4800_v45 = vsub.f32 %v2548_v0, %v2572_v47  ;;  %v2569_v32 = vpop.xlane.xlu0 %2568  ;;  %v2968_v0 = vld [vmem:[%s4869_s2 + $0x19] ss:$0 sm:$0xff] }
0x1096   :  { %v2575_v40 = vmul.f32 0.03125, %v2569_v32  ;;  %v2566_v50 = vpop.xlane.xlu1 %2565  ;;  %v2585_v34 = vmul.f32 %v4798_v49, %v4798_v49 }
0x1097   :  { %v2574_v48 = vmul.f32 0.03125, %v2566_v50  ;;  %v2584_v52 = vmul.f32 %v4800_v45, %v4800_v45 }
0x1098   :  { %v2581_v17 = vsub.f32 %v2551_v28, %v2575_v40  ;;  %v2597_v53 = vsel %vm348_vm1, %v2585_v34, 0.0 }
0x1099   :  { %v2580_v55 = vsub.f32 %v2550_v14, %v2574_v48  ;;  %2598 = vadd.xlane.f32.xlu0 %v2597_v53  ;;  %v2594_v35 = vsel %vm348_vm1, %v2584_v52, 0.0 }
0x109a   :  { %2595 = vadd.xlane.f32.xlu1 %v2594_v35  ;;  %v2587_v56 = vmul.f32 %v2581_v17, %v2581_v17  ;;  %v2652_v35 = vld [vmem:[%s4868_s1 + $0xe0] sm:$0xff] }
0x109b   :  { %v2586_v59 = vmul.f32 %v2580_v55, %v2580_v55 }
0x109c   :  { %v2603_v60 = vsel %vm348_vm1, %v2587_v56, 0.0 }
0x109d   :  { %2604 = vadd.xlane.f32.xlu0 %v2603_v60  ;;  %v2600_v61 = vsel %vm348_vm1, %v2586_v59, 0.0  ;;  %v2653_v59 = vld [vmem:[%s4868_s1 + $0xe8] sm:$0xff]  ;;  %v2654_v60 = vld [vmem:[%s4868_s1 + $0xf0] sm:$0xff] }
0x109e   :  { %2601 = vadd.xlane.f32.xlu1 %v2600_v61  ;;  %v3850_v61 = vpack.c.bf16 %v2654_v60, %v2653_v59 }
0x111c   :  { %v2593_v27 = vpop.xlane.xlu0 %2592 }
0x111d   :  { %v2607_v51 = vmul.f32 0.03125, %v2593_v27  ;;  %v2590_v63 = vpop.xlane.xlu1 %2589 }
0x111e   :  { %v2606_v39 = vmul.f32 0.03125, %v2590_v63 }
0x111f   :  { %v2613_v3 = vadd.f32 1e-05, %v2607_v51 }
0x1120   :  { %v2612_v4 = vadd.f32 1e-05, %v2606_v39  ;;  %v2970_v39 = vld [vmem:[%s4869_s2 + $0x20] ss:$0 sm:$0xff] }
0x1121   :  { %3941 = vrsqrt.f32 %v2613_v3  ;;  %v2971_v3 = vld [vmem:[%s4869_s2 + $0x21] ss:$0 sm:$0xff] }
0x1122   :  { %3943 = vrsqrt.f32 %v2612_v4 }
0x1126   :  { %v2599_v2 = vpop.xlane.xlu0 %2598 }
0x1127   :  { %v2609_v7 = vmul.f32 0.03125, %v2599_v2  ;;  %v2596_v16 = vpop.xlane.xlu1 %2595 }
0x1128   :  { %v2608_v10 = vmul.f32 0.03125, %v2596_v16 }
0x1129   :  { %v2615_v19 = vadd.f32 1e-05, %v2609_v7  ;;  %v2972_v7 = vld [vmem:[%s4869_s2 + $0x22] ss:$0 sm:$0xff] }
0x112a   :  { %v2614_v41 = vadd.f32 1e-05, %v2608_v10  ;;  %v2605_v57 = vpop.xlane.xlu0 %2604 }
0x112b   :  { %v3942_v20 = vpop.eup %3941  ;;  %3945 = vrsqrt.f32 %v2615_v19  ;;  %v2611_v8 = vmul.f32 0.03125, %v2605_v57  ;;  %v2602_v11 = vpop.xlane.xlu1 %2601 }
0x112c   :  { %v3944_v12 = vpop.eup %3943  ;;  %v2625_v23 = vmul.f32 %v3942_v20, %v2577_v26  ;;  %3947 = vrsqrt.f32 %v2614_v41  ;;  %v2610_v54 = vmul.f32 0.03125, %v2602_v11 }
0x112d   :  { %v2624_v1 = vmul.f32 %v3944_v12, %v2576_v31  ;;  %v2617_v24 = vadd.f32 1e-05, %v2611_v8 }
0x112e   :  { %v2616_v13 = vadd.f32 1e-05, %v2610_v54  ;;  %v2635_v58 = vmul.f32 %v2967_v6, %v2625_v23 }
0x112f   :  { %3949 = vrsqrt.f32 %v2617_v24  ;;  %v2634_v9 = vmul.f32 %v2967_v6, %v2624_v1 }
0x1130   :  { %3951 = vrsqrt.f32 %v2616_v13  ;;  %v2645_v15 = vadd.f32 %v2968_v0, %v2635_v58 }
0x1131   :  { %v2644_v22 = vadd.f32 %v2968_v0, %v2634_v9 }
0x1133   :  { %v3838_v28 = vpack.c.bf16 %v2645_v15, %v2644_v22 }
0x1135   :  { %v3946_v14 = vpop.eup %3945  ;;  %3839 = vmatpush3.bf16.msra.mxu0 %v3838_v28 }
0x1136   :  { %v3948_v18 = vpop.eup %3947  ;;  %v2627_v36 = vmul.f32 %v3946_v14, %v4798_v49  ;;  %3840 = vmatprep.subr.bf16.mxu0 %v3985_v62 }
0x1137   :  { %v2626_v29 = vmul.f32 %v3948_v18, %v4800_v45  ;;  %v2650_v45 = vld [vmem:[%s4868_s1 + $0xd0] sm:$0xff] }
0x1138   :  { %v2637_v21 = vmul.f32 %v2967_v6, %v2627_v36 }
0x1139   :  { %v3950_v5 = vpop.eup %3949  ;;  %v2636_v30 = vmul.f32 %v2967_v6, %v2626_v29 }
0x113a   :  { %v3952_v26 = vpop.eup %3951  ;;  %v2629_v31 = vmul.f32 %v3950_v5, %v2581_v17  ;;  %v2647_v33 = vadd.f32 %v2968_v0, %v2637_v21 }
0x113b   :  { %v2628_v37 = vmul.f32 %v3952_v26, %v2580_v55  ;;  %v2646_v38 = vadd.f32 %v2968_v0, %v2636_v30  ;;  %v2651_v55 = vld [vmem:[%s4868_s1 + $0xd8] sm:$0xff] }
0x113c   :  { %v2639_v42 = vmul.f32 %v2967_v6, %v2629_v31  ;;  %v3847_v56 = vpack.c.bf16 %v2652_v35, %v2651_v55 }
0x113d   :  { %v3841_v44 = vpack.c.bf16 %v2647_v33, %v2646_v38  ;;  %v2638_v25 = vmul.f32 %v2967_v6, %v2628_v37 }
0x113e   :  { %v2649_v46 = vadd.f32 %v2968_v0, %v2639_v42 }
0x113f   :  { %3842 = vmatpush3.bf16.msra.mxu0 %v3841_v44  ;;  %v2648_v47 = vadd.f32 %v2968_v0, %v2638_v25 }
0x1140   :  { %3843 = vmatprep.subr.bf16.mxu0 %v3985_v62 }
0x1141   :  { %v3844_v49 = vpack.c.bf16 %v2649_v46, %v2648_v47 }
0x1143   :  { %3845 = vmatpush3.bf16.msra.mxu0 %v3844_v49 }
0x1144   :  { %3846 = vmatprep.subr.bf16.mxu0 %v3985_v62 }
0x1146   :  { %3596 = vmatmul.mubr.msk.f32.vlgmr.msra.gmra.mrb[48].mxu0 %vm47_vm0, %v2650_v45 }
0x1147   :  { %3606 = vmatprep.mubr.msk.f32.mxu0 %vm3986_vm3, %v3987_v43  ;;  %3848 = vmatpush3.bf16.msra.mxu0 %v3847_v56 }
0x1148   :  { %3849 = vmatprep.subr.bf16.mxu0 %v3985_v62 }
0x114b   :  { %3851 = vmatpush3.bf16.msra.mxu0 %v3850_v61 }
0x1219   :  { %v2727_v32 = vpop.f32.mrb[48].mxu0 }
0x121a   :  { %v3597_v40 = vpop.f32.mrb[49].mxu0  ;;  %v2731_v50 = vsel %vm348_vm1, %v2727_v32, 0.0 }
0x121b   :  { %2732 = vadd.xlane.f32.xlu1 %v2731_v50 }
0x12a8   :  { %v2733_v34 = vpop.xlane.xlu1 %2732 }
0x12a9   :  { %v2734_v48 = vmul.f32 0.03125, %v2733_v34 }
0x12ab   :  { %v2735_v52 = vsub.f32 %v2727_v32, %v2734_v48 }
0x12ad   :  { %v2736_v17 = vmul.f32 %v2735_v52, %v2735_v52 }
0x12af   :  { %v2737_v53 = vsel %vm348_vm1, %v2736_v17, 0.0 }
0x12b0   :  { %2738 = vadd.xlane.f32.xlu0 %v2737_v53 }
0x133d   :  { %v2739_v43 = vpop.xlane.xlu0 %2738 }
0x133e   :  { %v2740_v27 = vmul.f32 0.03125, %v2739_v43 }
0x1340   :  { %v2741_v51 = vadd.f32 1e-05, %v2740_v27 }
0x1342   :  { %3953 = vrsqrt.f32 %v2741_v51 }
0x134c   :  { %v3954_v63 = vpop.eup %3953 }
0x134d   :  { %v2743_v62 = vmul.f32 %v3954_v63, %v2735_v52 }
0x134f   :  { %v2748_v4 = vmul.f32 %v2970_v39, %v2743_v62 }
0x1351   :  { %v2753_v2 = vadd.f32 %v2971_v3, %v2748_v4 }
0x1353   :  { %3607 = vmatmul.mubr.msk.f32.vlgmr.msra.gmra.mrb[50].mxu0 %vm348_vm1, %v2753_v2 }
0x1426   :  { %v2827_v16 = vpop.f32.mrb[50].mxu0 }
0x1427   :  { %v2828_v10 = vadd.f32 %v2972_v7, %v2827_v16  ;;  %v3608_v19 = vpop.f32.mrb[51].mxu0 }
0x1429   :  { %2832 = vst.msk [vmem:[#allocation2] sm:$0x3] %vm2831_vm4, %v2828_v10 }
0x142a   :  { %3971 = shalt.err (!%p3968_p4)
}
0x142b   :  { %s3972_s4 = scalar_lea.hbm %s4870_s3, 32 }
0x142c   :  { %p3973_p5 = scmp.ne.s32.totalorder %s4870_s3, %s3972_s4  ;;  %p3976_p6 = scmp.lt.u32.totalorder %s3972_s4, %s4870_s3 }
0x142e   :  { %p3978_p7 = pnand %p3976_p6, %p3973_p5 }
0x1430   :  { %3981 = shalt.err (!%p3978_p7)
}
0x1431   :  { %2842 = dma.vmem_to_hbm [thread:$0]  %s2840_s27, 32, %s4870_s3, [#allocation3]  }
0x1432   :  { %3982 = dma.done.wait [#allocation3], 32  }
0x1433   :  { %3983 = vsyncadd [#allocation3], 4294967264 }
0x1434   :  { %2846 = vsyncpa [#allocation3], 1 }

</bundles_post_ra>
